<compile_context>
chip_gen: v5e
topology: v5e:2x2
jax: 0.10.0
libtpu: 0.0.40
codegen_flags: <defaults>
</compile_context>

<pallas_src>
import math

import jax
import jax.numpy as jnp
from jax.experimental import pallas as pl
from jax.experimental.pallas import tpu as pltpu

HIDDEN_CONV_1 = 64
HIDDEN_CONV_2 = 32
PRE1 = 256
PRE2 = 128
FEAT_PAD = 128            # conv feature dims padded to one full lane register
NEG_SLOPE = 0.01          # F.leaky_relu default
L2_EPS = 1e-12            # guards zero rows (torch divides by the raw norm)
_MIB = 1024 * 1024


def _leaky(v):
    return jnp.where(v > 0, v, NEG_SLOPE * v)


def _round_up(v, m):
    return ((v + m - 1) // m) * m


def _vmem_limit(needed_bytes):
    # Right-sized for v7x's 64 MiB physical VMEM (streamed z1/z2 keeps the
    # live set O(block)); grow with the A tile but never past 56 MiB so the
    # same limit is safe on v5e/v6e/v7x.
    return int(min(56 * _MIB, max(32 * _MIB, needed_bytes + 8 * _MIB)))


def _plan_tiles(n, block_m, block_k):
    """Row/K tiles that (a) divide n_pad, (b) bound the quadratic A_hat
    padding by the row tile (not the large K tile), (c) get as close to the
    requested sizes as possible."""
    assert block_m % 128 == 0 and block_k % 128 == 0
    n128 = _round_up(max(n, 1), 128)
    bm = min(block_m, n128)
    n_pad = _round_up(n, bm)                 # pad granularity = row tile only
    units = n_pad // bm
    k_units_cap = max(1, min(block_k, n_pad) // bm)
    k_units = 1
    for d in range(k_units_cap, 0, -1):      # largest divisor of `units` <= cap
        if units % d == 0:
            k_units = d
            break
    return n_pad, bm, k_units * bm


# --------------------------------------------------------------------------
# Stage 1: preprocess1 -> leaky -> preprocess2 -> leaky -> project to conv1 in
# --------------------------------------------------------------------------
def _preprocess_kernel(x_ref, w1_ref, b1_ref, w2_ref, b2_ref, wc1_ref, z1_ref):
    f32 = jnp.float32
    cdt = w1_ref.dtype
    h = jnp.dot(x_ref[...], w1_ref[...], preferred_element_type=f32) + b1_ref[...]
    h = _leaky(h)
    h = jnp.dot(h.astype(cdt), w2_ref[...], preferred_element_type=f32) + b2_ref[...]
    h = _leaky(h)
    z1 = jnp.dot(h.astype(cdt), wc1_ref[...], preferred_element_type=f32)
    z1_ref[...] = z1.astype(z1_ref.dtype)


# --------------------------------------------------------------------------
# Stage 2: conv1 aggregation + (optional) tau blend + L2 norm + project for conv2
# --------------------------------------------------------------------------
def _make_conv1_kernel(tau, use_prev):
    def kernel(a_ref, z1_ref, bc1_ref, wc2_ref, *rest):
        if use_prev:
            prev_ref, emb0_ref, z2_ref, acc_ref = rest
        else:
            emb0_ref, z2_ref, acc_ref = rest
        k = pl.program_id(1)
        prod = jnp.dot(a_ref[...], z1_ref[...], preferred_element_type=jnp.float32)

        @pl.when(k == 0)
        def _():
            acc_ref[...] = prod          # no separate zero-fill pass

        @pl.when(k != 0)
        def _():
            acc_ref[...] += prod

        @pl.when(k == pl.num_programs(1) - 1)
        def _():
            g = _leaky(acc_ref[...] + bc1_ref[...])
            if use_prev:
                g = tau * prev_ref[...].astype(jnp.float32) + (1.0 - tau) * g
            g = g * jax.lax.rsqrt(jnp.sum(g * g, axis=1, keepdims=True) + L2_EPS)
            emb0_ref[...] = g.astype(emb0_ref.dtype)
            z2 = jnp.dot(g.astype(wc2_ref.dtype), wc2_ref[...],
                         preferred_element_type=jnp.float32)
            z2_ref[...] = z2.astype(z2_ref.dtype)

    return kernel


# --------------------------------------------------------------------------
# Stage 3: conv2 aggregation + (optional) tau blend
# --------------------------------------------------------------------------
def _make_conv2_kernel(tau, use_prev):
    def kernel(a_ref, z2_ref, bc2_ref, *rest):
        if use_prev:
            prev_ref, out_ref, acc_ref = rest
        else:
            out_ref, acc_ref = rest
        k = pl.program_id(1)
        prod = jnp.dot(a_ref[...], z2_ref[...], preferred_element_type=jnp.float32)

        @pl.when(k == 0)
        def _():
            acc_ref[...] = prod

        @pl.when(k != 0)
        def _():
            acc_ref[...] += prod

        @pl.when(k == pl.num_programs(1) - 1)
        def _():
            o = _leaky(acc_ref[...] + bc2_ref[...])
            if use_prev:
                o = tau * prev_ref[...].astype(jnp.float32) + (1.0 - tau) * o
            out_ref[...] = o.astype(out_ref.dtype)

    return kernel


# --------------------------------------------------------------------------
# Host-side helpers
# --------------------------------------------------------------------------
def gcn_normalized_adjacency(edge_index, num_nodes):
    """Dense D^{-1/2} (A + I) D^{-1/2}, matching torch_geometric gcn_norm
    (add_self_loops=True, symmetric normalization, A[target, source])."""
    src, dst = edge_index[0], edge_index[1]
    a = jnp.zeros((num_nodes, num_nodes), jnp.float32)
    a = a.at[dst, src].add(1.0)
    a = a + jnp.eye(num_nodes, dtype=jnp.float32)
    deg = jnp.sum(a, axis=1)
    dinv = jnp.where(deg > 0, 1.0 / jnp.sqrt(deg), 0.0)
    return dinv[:, None] * a * dinv[None, :]


def _pad_to(arr, shape):
    pads = [(0, t - s) for s, t in zip(arr.shape, shape)]
    return jnp.pad(arr, pads)


def roland_forward(x, edge_index, params, prev0=None, prev1=None, tau=0.0,
                   *, a_hat=None, block_m=512, block_k=2048, a_buffers=2,
                   compute_dtype=jnp.bfloat16, out_dtype=jnp.bfloat16):
    (w1, b1, w2, b2, wc1, bc1, wc2, bc2) = params
    n, d_in = x.shape
    f32 = jnp.float32
    cdt = compute_dtype
    csz = jnp.dtype(cdt).itemsize
    osz = jnp.dtype(out_dtype).itemsize

    tau = float(tau)
    use_prev = tau != 0.0     # tau == 0 -> blend is identity; skip prev DMA/FMA

    n_pad, block_m, block_k = _plan_tiles(n, block_m, block_k)
    d_pad = _round_up(max(d_in, 1), FEAT_PAD)

    if a_hat is None:
        a_hat = gcn_normalized_adjacency(edge_index, n)
    a_pad = _pad_to(a_hat.astype(f32), (n_pad, n_pad)).astype(cdt)
    x_pad = _pad_to(x.astype(f32), (n_pad, d_pad)).astype(cdt)

    w1_p = _pad_to(w1, (d_pad, PRE1)).astype(cdt)
    w2_p = w2.astype(cdt)
    wc1_p = _pad_to(wc1, (PRE2, FEAT_PAD)).astype(cdt)
    wc2_p = _pad_to(wc2, (FEAT_PAD, FEAT_PAD)).astype(cdt)
    b1_p = b1.astype(f32)
    b2_p = b2.astype(f32)
    bc1_p = _pad_to(bc1, (1, FEAT_PAD)).astype(f32)
    bc2_p = _pad_to(bc2, (1, FEAT_PAD)).astype(f32)

    grid_rows = n_pad // block_m
    grid_k = n_pad // block_k

    # A_hat stream: a_buffers=3 deepens pipelining on 128 MiB parts (v5e/v6e)
    # once the tile is >= 2 MiB; keep the default double-buffering on v7x.
    if a_buffers == 2:
        a_spec = pl.BlockSpec((block_m, block_k), lambda i, k: (i, k))
    else:
        a_spec = pl.BlockSpec((block_m, block_k), lambda i, k: (i, k),
                              pipeline_mode=pl.Buffered(a_buffers))

    # ---- stage 1: row-parallel preprocess, weights resident in VMEM --------
    rows1 = block_k                         # fat row tile (divides n_pad)
    if rows1 * d_pad * csz > 8 * _MIB:      # bound the x tile for huge input_dim
        rows1 = block_m
    s1_vmem = (2 * rows1 * d_pad * csz + 2 * rows1 * FEAT_PAD * csz
               + 2 * (d_pad * PRE1 + PRE1 * PRE2 + PRE2 * FEAT_PAD) * csz
               + rows1 * PRE1 * 4)
    z1_pad = pl.pallas_call(
        _preprocess_kernel,
        out_shape=jax.ShapeDtypeStruct((n_pad, FEAT_PAD), cdt),
        grid=(n_pad // rows1,),
        in_specs=[
            pl.BlockSpec((rows1, d_pad), lambda i: (i, 0)),     # x tile
            pl.BlockSpec((d_pad, PRE1), lambda i: (0, 0)),      # W1
            pl.BlockSpec((1, PRE1), lambda i: (0, 0)),          # b1
            pl.BlockSpec((PRE1, PRE2), lambda i: (0, 0)),       # W2
            pl.BlockSpec((1, PRE2), lambda i: (0, 0)),          # b2
            pl.BlockSpec((PRE2, FEAT_PAD), lambda i: (0, 0)),   # Wc1 (padded)
        ],
        out_specs=pl.BlockSpec((rows1, FEAT_PAD), lambda i: (i, 0)),
        compiler_params=pltpu.CompilerParams(
            dimension_semantics=("parallel",),
            vmem_limit_bytes=_vmem_limit(s1_vmem)),
    )(x_pad, w1_p, b1_p, w2_p, b2_p, wc1_p)

    # VMEM estimate for the aggregation stages (A stream + streamed z + outs).
    agg_vmem = (max(a_buffers, 2) * block_m * block_k * csz
                + 2 * block_k * FEAT_PAD * csz
                + 2 * block_m * FEAT_PAD * (osz + csz)
                + (2 * block_m * FEAT_PAD * csz if use_prev else 0)
                + block_m * FEAT_PAD * 4)
    agg_params = pltpu.CompilerParams(
        dimension_semantics=("parallel", "arbitrary"),
        vmem_limit_bytes=_vmem_limit(agg_vmem))

    # ---- stage 2: conv1 aggregation (A_hat tiled, z1 streamed per K tile) ---
    conv1_inputs = [a_pad, z1_pad, bc1_p, wc2_p]
    conv1_in_specs = [
        a_spec,
        pl.BlockSpec((block_k, FEAT_PAD), lambda i, k: (k, 0)),  # z1 streamed
        pl.BlockSpec((1, FEAT_PAD), lambda i, k: (0, 0)),        # bc1
        pl.BlockSpec((FEAT_PAD, FEAT_PAD), lambda i, k: (0, 0)), # Wc2
    ]
    if use_prev:
        if prev0 is None:
            prev0 = jnp.zeros((n, HIDDEN_CONV_1), f32)
        prev0_p = _pad_to(prev0.astype(f32), (n_pad, FEAT_PAD)).astype(cdt)
        conv1_inputs.append(prev0_p)
        conv1_in_specs.append(pl.BlockSpec((block_m, FEAT_PAD), lambda i, k: (i, 0)))

    emb0_pad, z2_pad = pl.pallas_call(
        _make_conv1_kernel(tau, use_prev),
        out_shape=(jax.ShapeDtypeStruct((n_pad, FEAT_PAD), out_dtype),
                   jax.ShapeDtypeStruct((n_pad, FEAT_PAD), cdt)),
        grid=(grid_rows, grid_k),
        in_specs=conv1_in_specs,
        out_specs=(pl.BlockSpec((block_m, FEAT_PAD), lambda i, k: (i, 0)),
                   pl.BlockSpec((block_m, FEAT_PAD), lambda i, k: (i, 0))),
        scratch_shapes=[pltpu.VMEM((block_m, FEAT_PAD), f32)],
        compiler_params=agg_params,
    )(*conv1_inputs)

    # ---- stage 3: conv2 aggregation (z2 streamed per K tile) ----------------
    conv2_inputs = [a_pad, z2_pad, bc2_p]
    conv2_in_specs = [
        a_spec,
        pl.BlockSpec((block_k, FEAT_PAD), lambda i, k: (k, 0)),  # z2 streamed
        pl.BlockSpec((1, FEAT_PAD), lambda i, k: (0, 0)),        # bc2
    ]
    if use_prev:
        if prev1 is None:
            prev1 = jnp.zeros((n, HIDDEN_CONV_2), f32)
        prev1_p = _pad_to(prev1.astype(f32), (n_pad, FEAT_PAD)).astype(cdt)
        conv2_inputs.append(prev1_p)
        conv2_in_specs.append(pl.BlockSpec((block_m, FEAT_PAD), lambda i, k: (i, 0)))

    out_pad = pl.pallas_call(
        _make_conv2_kernel(tau, use_prev),
        out_shape=jax.ShapeDtypeStruct((n_pad, FEAT_PAD), out_dtype),
        grid=(grid_rows, grid_k),
        in_specs=conv2_in_specs,
        out_specs=pl.BlockSpec((block_m, FEAT_PAD), lambda i, k: (i, 0)),
        scratch_shapes=[pltpu.VMEM((block_m, FEAT_PAD), f32)],
        compiler_params=agg_params,
    )(*conv2_inputs)

    out = out_pad[:n, :HIDDEN_CONV_2]
    emb0 = emb0_pad[:n, :HIDDEN_CONV_1]
    # out and current_embeddings[1] are the same tensor in the torch module;
    # alias in the wrapper instead of writing a duplicate copy to HBM.
    return out, (emb0, out)


def init_params(key, input_dim):
    """Deterministic synthetic parameters (shapes from ROLANDGNN.__init__).
    Weights stored as (in, out) so the kernel does x @ W; biases as (1, out)."""
    ks = jax.random.split(key, 8)

    def lin(kw, kb, fan_in, fan_out):
        bound = 1.0 / jnp.sqrt(fan_in)
        w = jax.random.uniform(kw, (fan_in, fan_out), jnp.float32, -bound, bound)
        b = jax.random.uniform(kb, (1, fan_out), jnp.float32, -bound, bound)
        return w, b

    w1, b1 = lin(ks[0], ks[1], input_dim, PRE1)                  # preprocess1
    w2, b2 = lin(ks[2], ks[3], PRE1, PRE2)                       # preprocess2
    wc1, bc1 = lin(ks[4], ks[5], PRE2, HIDDEN_CONV_1)            # conv1
    wc2, bc2 = lin(ks[6], ks[7], HIDDEN_CONV_1, HIDDEN_CONV_2)   # conv2
    return (w1, b1, w2, b2, wc1, bc1, wc2, bc2)


def reference_forward(x, edge_index, params, prev0, prev1, tau=0.0,
                      compute_dtype=jnp.bfloat16, out_dtype=jnp.bfloat16):
    """Pure-JAX reference mirroring the PyTorch forward ('moving' update,
    dropout=0) with the same bf16-operand / f32-accumulate / bf16-store
    numerics as the kernels."""
    (w1, b1, w2, b2, wc1, bc1, wc2, bc2) = params
    cdt = compute_dtype
    f32 = jnp.float32
    a = gcn_normalized_adjacency(edge_index, x.shape[0]).astype(cdt)
    h = _leaky(jnp.dot(x.astype(cdt), w1.astype(cdt), preferred_element_type=f32) + b1)
    h = _leaky(jnp.dot(h.astype(cdt), w2.astype(cdt), preferred_element_type=f32) + b2)
    z1 = jnp.dot(h.astype(cdt), wc1.astype(cdt), preferred_element_type=f32).astype(cdt)
    g = _leaky(jnp.dot(a, z1, preferred_element_type=f32) + bc1)
    if tau != 0.0:
        g = tau * prev0.astype(cdt).astype(f32) + (1.0 - tau) * g
    g = g * jax.lax.rsqrt(jnp.sum(g * g, axis=1, keepdims=True) + L2_EPS)
    emb0 = g.astype(out_dtype)
    z2 = jnp.dot(g.astype(cdt), wc2.astype(cdt), preferred_element_type=f32).astype(cdt)
    o = _leaky(jnp.dot(a, z2, preferred_element_type=f32) + bc2)
    if tau != 0.0:
        o = tau * prev1.astype(cdt).astype(f32) + (1.0 - tau) * o
    o = o.astype(out_dtype)
    return o, emb0, o


if __name__ == "__main__":
    key = jax.random.PRNGKey(0)
    k_x, k_e, k_p, k_p0, k_p1 = jax.random.split(key, 5)

    num_nodes = 200      # pads to 256
    input_dim = 8
    num_edges = 600
    f32 = jnp.float32

    x = jax.random.normal(k_x, (num_nodes, input_dim), jnp.float32)
    edge_index = jax.random.randint(k_e, (2, num_edges), 0, num_nodes, jnp.int32)
    params = init_params(k_p, input_dim)

    ref_out, ref_emb0, _ = reference_forward(x, edge_index, params, None, None, 0.0)

    # default path: tau == 0 ('moving' update), previous embeddings unused;
    # default big tiles (planner shrinks to the 256-node padded graph).
    out, (emb0, emb1) = roland_forward(x, edge_index, params, tau=0.0)
    out = jax.block_until_ready(out)
    emb0 = jax.block_until_ready(emb0)
    emb1 = jax.block_until_ready(emb1)

    assert out.shape == (num_nodes, HIDDEN_CONV_2)
    assert emb0.shape == (num_nodes, HIDDEN_CONV_1)
    assert emb1.shape == (num_nodes, HIDDEN_CONV_2)
    assert jnp.allclose(out.astype(f32), ref_out.astype(f32), atol=1e-2, rtol=1e-2)
    assert jnp.allclose(emb0.astype(f32), ref_emb0.astype(f32), atol=1e-2, rtol=1e-2)
    assert jnp.allclose(emb1.astype(f32), ref_out.astype(f32), atol=1e-2, rtol=1e-2)

    # small explicit tiles to exercise the multi-K accumulation path (2x2 grid)
    out_s, (emb0_s, _) = roland_forward(
        x, edge_index, params, tau=0.0, block_m=128, block_k=128)
    out_s = jax.block_until_ready(out_s)
    assert jnp.allclose(out_s.astype(f32), ref_out.astype(f32), atol=1e-2, rtol=1e-2)
    assert jnp.allclose(emb0_s.astype(f32), ref_emb0.astype(f32), atol=1e-2, rtol=1e-2)

    # tau != 0 path exercises the previous-embedding blend kernels
    prev0 = jax.random.normal(k_p0, (num_nodes, HIDDEN_CONV_1), jnp.float32)
    prev1 = jax.random.normal(k_p1, (num_nodes, HIDDEN_CONV_2), jnp.float32)
    out_t, (emb0_t, _) = roland_forward(
        x, edge_index, params, prev0, prev1, tau=0.25)
    out_t = jax.block_until_ready(out_t)
    ref_out_t, ref_emb0_t, _ = reference_forward(
        x, edge_index, params, prev0, prev1, 0.25)
    assert jnp.allclose(out_t.astype(f32), ref_out_t.astype(f32), atol=1e-2, rtol=1e-2)
    assert jnp.allclose(emb0_t.astype(f32), ref_emb0_t.astype(f32), atol=1e-2, rtol=1e-2)

    print("KERNEL_OK")
</pallas_src>

<mosaic_0001>
module attributes {stable_mosaic.version = 11 : i64} {
  func.func @_preprocess_kernel(%arg0: i32, %arg1: memref<256x128xbf16, #tpu.memory_space<vmem>>, %arg2: memref<128x256xbf16, #tpu.memory_space<vmem>>, %arg3: memref<1x256xf32, #tpu.memory_space<vmem>>, %arg4: memref<256x128xbf16, #tpu.memory_space<vmem>>, %arg5: memref<1x128xf32, #tpu.memory_space<vmem>>, %arg6: memref<128x128xbf16, #tpu.memory_space<vmem>>, %arg7: memref<256x128xbf16, #tpu.memory_space<vmem>>) attributes {dimension_semantics = [#tpu.dimension_semantics<parallel>], iteration_bounds = array<i64: 1>, scalar_prefetch = 0 : i64, scratch_operands = 0 : i64, tpu.core_type = #tpu.core_type<tc>, window_params = [{transform_indices = @transform_0, window_bounds = array<i64: 256, 128>}, {pipeline_mode = #tpu.pipeline_mode<synchronous>, transform_indices = @transform_1, window_bounds = array<i64: 128, 256>}, {pipeline_mode = #tpu.pipeline_mode<synchronous>, transform_indices = @transform_2, window_bounds = array<i64: 1, 256>}, {pipeline_mode = #tpu.pipeline_mode<synchronous>, transform_indices = @transform_3, window_bounds = array<i64: 256, 128>}, {pipeline_mode = #tpu.pipeline_mode<synchronous>, transform_indices = @transform_4, window_bounds = array<i64: 1, 128>}, {pipeline_mode = #tpu.pipeline_mode<synchronous>, transform_indices = @transform_5, window_bounds = array<i64: 128, 128>}, {transform_indices = @transform_6, window_bounds = array<i64: 256, 128>}]} {
    %c0 = arith.constant 0 : index
    %c0_0 = arith.constant 0 : index
    %0 = vector.load %arg1[%c0, %c0_0] : memref<256x128xbf16, #tpu.memory_space<vmem>>, vector<256x128xbf16>
    %c0_1 = arith.constant 0 : index
    %c0_2 = arith.constant 0 : index
    %1 = vector.load %arg2[%c0_1, %c0_2] : memref<128x256xbf16, #tpu.memory_space<vmem>>, vector<128x256xbf16>
    %cst = arith.constant dense<0.000000e+00> : vector<256x256xf32>
    %2 = tpu.matmul %0, %1, %cst {dimension_numbers = #tpu.dot_dimension_numbers<[1], [0], [0], [1], [0, 0, 1, 1], [], []>} : vector<256x128xbf16>, vector<128x256xbf16>, vector<256x256xf32> -> vector<256x256xf32>
    %c0_3 = arith.constant 0 : index
    %c0_4 = arith.constant 0 : index
    %3 = vector.load %arg3[%c0_3, %c0_4] : memref<1x256xf32, #tpu.memory_space<vmem>>, vector<1x256xf32>
    %4 = vector.broadcast %3 : vector<1x256xf32> to vector<256x256xf32>
    %5 = arith.addf %2, %4 : vector<256x256xf32>
    %cst_5 = arith.constant 0.000000e+00 : f32
    %6 = vector.broadcast %cst_5 : f32 to vector<256x256xf32>
    %7 = arith.cmpf ogt, %5, %6 : vector<256x256xf32>
    %cst_6 = arith.constant 0.00999999977 : f32
    %8 = vector.broadcast %cst_6 : f32 to vector<256x256xf32>
    %9 = arith.mulf %8, %5 : vector<256x256xf32>
    %10 = arith.select %7, %5, %9 : vector<256x256xi1>, vector<256x256xf32>
    %11 = arith.truncf %10 : vector<256x256xf32> to vector<256x256xbf16>
    %c0_7 = arith.constant 0 : index
    %c0_8 = arith.constant 0 : index
    %12 = vector.load %arg4[%c0_7, %c0_8] : memref<256x128xbf16, #tpu.memory_space<vmem>>, vector<256x128xbf16>
    %cst_9 = arith.constant dense<0.000000e+00> : vector<256x128xf32>
    %13 = tpu.matmul %11, %12, %cst_9 {dimension_numbers = #tpu.dot_dimension_numbers<[1], [0], [0], [1], [0, 0, 1, 1], [], []>} : vector<256x256xbf16>, vector<256x128xbf16>, vector<256x128xf32> -> vector<256x128xf32>
    %c0_10 = arith.constant 0 : index
    %c0_11 = arith.constant 0 : index
    %14 = vector.load %arg5[%c0_10, %c0_11] : memref<1x128xf32, #tpu.memory_space<vmem>>, vector<1x128xf32>
    %15 = vector.broadcast %14 : vector<1x128xf32> to vector<256x128xf32>
    %16 = arith.addf %13, %15 : vector<256x128xf32>
    %cst_12 = arith.constant 0.000000e+00 : f32
    %17 = vector.broadcast %cst_12 : f32 to vector<256x128xf32>
    %18 = arith.cmpf ogt, %16, %17 : vector<256x128xf32>
    %cst_13 = arith.constant 0.00999999977 : f32
    %19 = vector.broadcast %cst_13 : f32 to vector<256x128xf32>
    %20 = arith.mulf %19, %16 : vector<256x128xf32>
    %21 = arith.select %18, %16, %20 : vector<256x128xi1>, vector<256x128xf32>
    %22 = arith.truncf %21 : vector<256x128xf32> to vector<256x128xbf16>
    %c0_14 = arith.constant 0 : index
    %c0_15 = arith.constant 0 : index
    %23 = vector.load %arg6[%c0_14, %c0_15] : memref<128x128xbf16, #tpu.memory_space<vmem>>, vector<128x128xbf16>
    %cst_16 = arith.constant dense<0.000000e+00> : vector<256x128xf32>
    %24 = tpu.matmul %22, %23, %cst_16 {dimension_numbers = #tpu.dot_dimension_numbers<[1], [0], [0], [1], [0, 0, 1, 1], [], []>} : vector<256x128xbf16>, vector<128x128xbf16>, vector<256x128xf32> -> vector<256x128xf32>
    %25 = arith.truncf %24 : vector<256x128xf32> to vector<256x128xbf16>
    %c0_17 = arith.constant 0 : index
    %c0_18 = arith.constant 0 : index
    %26 = vector.load %arg7[%c0_17, %c0_18] : memref<256x128xbf16, #tpu.memory_space<vmem>>, vector<256x128xbf16>
    tpu.vector_store %arg7[%c0_17, %c0_18], %25 {strides = array<i32>} : memref<256x128xbf16, #tpu.memory_space<vmem>>, vector<256x128xbf16>,
    return
  }
  func.func @transform_0(%arg0: i32) -> (i32, i32) {
    %c0_i32 = arith.constant 0 : i32
    %c0_i32_0 = arith.constant 0 : i32
    return %arg0, %c0_i32 : i32, i32
  }
  func.func @transform_1(%arg0: i32) -> (i32, i32) {
    %c0_i32 = arith.constant 0 : i32
    %c0_i32_0 = arith.constant 0 : i32
    %c0_i32_1 = arith.constant 0 : i32
    return %c0_i32, %c0_i32_0 : i32, i32
  }
  func.func @transform_2(%arg0: i32) -> (i32, i32) {
    %c0_i32 = arith.constant 0 : i32
    %c0_i32_0 = arith.constant 0 : i32
    %c0_i32_1 = arith.constant 0 : i32
    return %c0_i32, %c0_i32_0 : i32, i32
  }
  func.func @transform_3(%arg0: i32) -> (i32, i32) {
    %c0_i32 = arith.constant 0 : i32
    %c0_i32_0 = arith.constant 0 : i32
    %c0_i32_1 = arith.constant 0 : i32
    return %c0_i32, %c0_i32_0 : i32, i32
  }
  func.func @transform_4(%arg0: i32) -> (i32, i32) {
    %c0_i32 = arith.constant 0 : i32
    %c0_i32_0 = arith.constant 0 : i32
    %c0_i32_1 = arith.constant 0 : i32
    return %c0_i32, %c0_i32_0 : i32, i32
  }
  func.func @transform_5(%arg0: i32) -> (i32, i32) {
    %c0_i32 = arith.constant 0 : i32
    %c0_i32_0 = arith.constant 0 : i32
    %c0_i32_1 = arith.constant 0 : i32
    return %c0_i32, %c0_i32_0 : i32, i32
  }
  func.func @transform_6(%arg0: i32) -> (i32, i32) {
    %c0_i32 = arith.constant 0 : i32
    %c0_i32_0 = arith.constant 0 : i32
    return %arg0, %c0_i32 : i32, i32
  }
}

</mosaic_0001>

<bundles_post_ra>
// kernel: tpu_custom_call.1
= control target key start
LH: loop header
LB: loop body
LE: loop exit
PB: predicated region body
PF: predicated region fallthrough
CT: control target
= control target key end

     0   :  { %11 = vsyncpa [#allocation3], 0  ;;  %s2309_s0 = inlined_call_operand.hbm [shape: bf16[256,128], index: 0, kind: input, shape index: {}]   ;;  %s2310_s1 = inlined_call_operand.hbm [shape: bf16[128,256], index: 1, kind: input, shape index: {}]   ;;  %s2311_s2 = inlined_call_operand.hbm [shape: f32[1,256], index: 2, kind: input, shape index: {}]   ;;  %s2312_s3 = inlined_call_operand.hbm [shape: bf16[256,128], index: 3, kind: input, shape index: {}]   ;;  %s2313_s4 = inlined_call_operand.vmem [shape: f32[1,128], index: 4, kind: input, shape index: {}]   ;;  %s2314_s5 = inlined_call_operand.hbm [shape: bf16[128,128], index: 5, kind: input, shape index: {}]   ;;  %s2315_s6 = inlined_call_operand.hbm [shape: bf16[256,128], index: 6, kind: output, shape index: {}]  }
   0x1   :  { %12 = vsyncpa [#allocation6], 0 }
   0x2   :  { %13 = vsyncpa [#allocation9], 0  ;;  %s32_s23 = sshll.u32 %s2310_s1, 4  ;;  %s33_s23 = int_to_ptr.hbm [resolvable:$true] %s32_s23 }
   0x3   :  { %14 = vsyncpa [#allocation4], 0  ;;  %s1954_s24 = smov [#allocation5]   ;;  %s1955_s26 = smov 128  }
   0x4   :  { %s34_s25 = sshll.u32 %s1954_s24, 4  ;;  %s1956_s27 = smov 8   ;;  %s35_s25 = int_to_ptr.vmem [resolvable:$true] %s34_s25 }
   0x5   :  { %40 = dma.hbm_to_vmem [thread:$0]  %s33_s23, 2048, %s35_s25, [#allocation6], %s1955_s26, %s1955_s26, %s1956_s27  }
   0x6   :  { %s56_s30 = sshll.u32 %s2312_s3, 4  ;;  %s1957_s7 = smov [#allocation8]   ;;  %s57_s30 = int_to_ptr.hbm [resolvable:$true] %s56_s30 }
   0x7   :  { %s58_s8 = sshll.u32 %s1957_s7, 4  ;;  %s19_s11 = sshll.u32 %s2309_s0, 4  ;;  %s59_s8 = int_to_ptr.vmem [resolvable:$true] %s58_s8  ;;  %s20_s11 = int_to_ptr.hbm [resolvable:$true] %s19_s11 }
   0x8   :  { %s1958_s1 = smov 64   ;;  %s1959_s12 = smov 4  }
   0x9   :  { %64 = dma.hbm_to_vmem [thread:$0]  %s57_s30, 2048, %s59_s8, [#allocation9], %s1958_s1, %s1958_s1, %s1959_s12  }
   0xa   :  { %s46_s15 = sshll.u32 %s2311_s2, 4  ;;  %s1960_s3 = smov [#allocation2]   ;;  %s47_s15 = int_to_ptr.hbm [resolvable:$true] %s46_s15 }
   0xb   :  { %s21_s16 = sshll.u32 %s1960_s3, 4  ;;  %s1961_s0 = smov [#allocation7]   ;;  %s22_s16 = int_to_ptr.vmem [resolvable:$true] %s21_s16 }
   0xc   :  { %27 = dma.hbm_to_vmem [thread:$0]  %s20_s11, 2048, %s22_s16, [#allocation3], %s1958_s1, %s1958_s1, %s1959_s12  }
   0xd   :  { %s48_s17 = sshll.u32 %s1961_s0, 4  ;;  %s71_s20 = sshll.u32 %s2314_s5, 4  ;;  %s49_s17 = int_to_ptr.vmem [resolvable:$true] %s48_s17  ;;  %s72_s20 = int_to_ptr.hbm [resolvable:$true] %s71_s20 }
   0xe   :  { %51 = dma.hbm_to_vmem [thread:$0]  %s47_s15, 32, %s49_s17, [#allocation6]  }
   0xf   :  { %s1962_s21 = smov [#allocation10]  }
  0x10   :  { %s73_s22 = sshll.u32 %s1962_s21, 4  ;;  %s74_s22 = int_to_ptr.vmem [resolvable:$true] %s73_s22 }
  0x11   :  { %79 = dma.hbm_to_vmem [thread:$0]  %s72_s20, 1024, %s74_s22, [#allocation9], %s1958_s1, %s1958_s1, %s1959_s12  }
  0x12   :  { %1946 = dma.done.wait [#allocation3], 2048  }
  0x13   :  { %1947 = vsyncadd [#allocation3], 4294965248 }
  0x14   :  { %1948 = dma.done.wait [#allocation6], 2080  }
  0x15   :  { %1949 = vsyncadd [#allocation6], 4294965216 }
  0x16   :  { %1950 = dma.done.wait [#allocation9], 3072  }
  0x17   :  { %1951 = vsyncadd [#allocation9], 4294964224  ;;  %v1514_v0 = vld [vmem:[#allocation5 + $0x70] sm:$0xf]  ;;  %v1647_v1 = vld [vmem:[#allocation5 + $0x74] sm:$0xf0] }
  0x18   :  { %v1506_v2 = vld [vmem:[#allocation5 + $0x60] sm:$0xf]  ;;  %v1515_v3 = vor.u32 %v1647_v1, %v1514_v0  ;;  %v1645_v4 = vld [vmem:[#allocation5 + $0x64] sm:$0xf0]  ;;  %v1498_v6 = vld [vmem:[#allocation5 + $0x50] sm:$0xf] }
  0x19   :  { %v1507_v5 = vor.u32 %v1645_v4, %v1506_v2  ;;  %v1643_v7 = vld [vmem:[#allocation5 + $0x54] sm:$0xf0]  ;;  %v1490_v9 = vld [vmem:[#allocation5 + $0x40] sm:$0xf]  ;;  %v1641_v10 = vld [vmem:[#allocation5 + $0x44] sm:$0xf0] }
  0x1a   :  { %330 = vmatpush.bf16.msra.mxu0 %v1515_v3  ;;  %1767 = vmatpush.bf16.msra.mxu1 %v1515_v3  ;;  %v1499_v8 = vor.u32 %v1643_v7, %v1498_v6  ;;  %v1491_v11 = vor.u32 %v1641_v10, %v1490_v9  ;;  %v1482_v12 = vld [vmem:[#allocation5 + $0x30] sm:$0xf]  ;;  %v1639_v13 = vld [vmem:[#allocation5 + $0x34] sm:$0xf0]  ;;  %v1474_v15 = vld [vmem:[#allocation5 + $0x20] sm:$0xf] }
  0x1b   :  { %1768 = vmatpush.bf16.msra.mxu2 %v1515_v3  ;;  %1769 = vmatpush.bf16.msra.mxu3 %v1515_v3  ;;  %v1483_v14 = vor.u32 %v1639_v13, %v1482_v12  ;;  %v1637_v16 = vld [vmem:[#allocation5 + $0x24] sm:$0xf0]  ;;  %v1466_v18 = vld [vmem:[#allocation5 + $0x10] sm:$0xf]  ;;  %v1635_v19 = vld [vmem:[#allocation5 + $0x14] sm:$0xf0] }
  0x1c   :  { %v1475_v17 = vor.u32 %v1637_v16, %v1474_v15  ;;  %v1467_v20 = vor.u32 %v1635_v19, %v1466_v18  ;;  %v1458_v21 = vld [vmem:[#allocation5] sm:$0xf]  ;;  %v1633_v22 = vld [vmem:[#allocation5 + $0x4] sm:$0xf0]  ;;  %v1646_v23 = vld [vmem:[#allocation5 + $0x74] sm:$0xf] }
  0x1d   :  { %v1516_v24 = vld [vmem:[#allocation5 + $0x78] sm:$0xf0]  ;;  %v1459_v25 = vor.u32 %v1633_v22, %v1458_v21  ;;  %v1644_v27 = vld [vmem:[#allocation5 + $0x64] sm:$0xf]  ;;  %v1508_v28 = vld [vmem:[#allocation5 + $0x68] sm:$0xf0] }
  0x1e   :  { %331 = vmatpush.bf16.msra.mxu0 %v1507_v5  ;;  %1770 = vmatpush.bf16.msra.mxu1 %v1507_v5  ;;  %v1519_v26 = vor.u32 %v1646_v23, %v1516_v24  ;;  %v1616_v29 = vld [vmem:[#allocation2] sm:$0xff]  ;;  %v1511_v31 = vor.u32 %v1644_v27, %v1508_v28  ;;  %v1642_v32 = vld [vmem:[#allocation5 + $0x54] sm:$0xf]  ;;  %v1500_v33 = vld [vmem:[#allocation5 + $0x58] sm:$0xf0]  ;;  %s1377_s26 = sshll.u32 %s2315_s6, 4  ;;  %s1378_s26 = int_to_ptr.hbm [resolvable:$true] %s1377_s26 }
  0x1f   :  { %1771 = vmatpush.bf16.msra.mxu2 %v1507_v5  ;;  %1772 = vmatpush.bf16.msra.mxu3 %v1507_v5  ;;  %v2023_v30 = vld [vmem:[#allocation2 + $0x20] sm:$0xff]  ;;  %v1503_v34 = vor.u32 %v1642_v32, %v1500_v33  ;;  %v1492_v36 = vld [vmem:[#allocation5 + $0x48] sm:$0xf0]  ;;  %v1638_v38 = vld [vmem:[#allocation5 + $0x34] sm:$0xf] }
  0x20   :  { %v1640_v35 = vld [vmem:[#allocation5 + $0x44] sm:$0xf]  ;;  %v1484_v39 = vld [vmem:[#allocation5 + $0x38] sm:$0xf0]  ;;  %v1476_v42 = vld [vmem:[#allocation5 + $0x28] sm:$0xf0] }
  0x21   :  { %v1495_v37 = vor.u32 %v1640_v35, %v1492_v36  ;;  %v1487_v40 = vor.u32 %v1638_v38, %v1484_v39  ;;  %v1636_v41 = vld [vmem:[#allocation5 + $0x24] sm:$0xf]  ;;  %v1617_v43 = vld [vmem:[#allocation2 + $0x8] sm:$0xff]  ;;  %v1634_v46 = vld [vmem:[#allocation5 + $0x14] sm:$0xf] }
  0x22   :  { %332 = vmatpush.bf16.msra.mxu0 %v1499_v8  ;;  %1773 = vmatpush.bf16.msra.mxu1 %v1499_v8  ;;  %v2026_v44 = vld [vmem:[#allocation2 + $0x28] sm:$0xff]  ;;  %v1479_v45 = vor.u32 %v1636_v41, %v1476_v42  ;;  %v1468_v47 = vld [vmem:[#allocation5 + $0x18] sm:$0xf0]  ;;  %v1632_v49 = vld [vmem:[#allocation5 + $0x4] sm:$0xf] }
  0x23   :  { %1774 = vmatpush.bf16.msra.mxu2 %v1499_v8  ;;  %1775 = vmatpush.bf16.msra.mxu3 %v1499_v8  ;;  %v1471_v48 = vor.u32 %v1634_v46, %v1468_v47  ;;  %v1460_v50 = vld [vmem:[#allocation5 + $0x8] sm:$0xf0]  ;;  %v1618_v52 = vld [vmem:[#allocation2 + $0x10] sm:$0xff]  ;;  %v2032_v54 = vld [vmem:[#allocation2 + $0x40] sm:$0xff] }
  0x24   :  { %v1463_v51 = vor.u32 %v1632_v49, %v1460_v50  ;;  %v2029_v53 = vld [vmem:[#allocation2 + $0x30] sm:$0xff]  ;;  %v1619_v55 = vld [vmem:[#allocation2 + $0x18] sm:$0xff]  ;;  %v2038_v57 = vld [vmem:[#allocation2 + $0x48] sm:$0xff] }
  0x25   :  { %v2035_v56 = vld [vmem:[#allocation2 + $0x38] sm:$0xff]  ;;  %v2041_v58 = vld [vmem:[#allocation2 + $0x50] sm:$0xff]  ;;  %v1652_v62 = vld [vmem:[#allocation8 + $0x20] sm:$0xff] }
  0x26   :  { %333 = vmatpush.bf16.msra.mxu0 %v1491_v11  ;;  %1776 = vmatpush.bf16.msra.mxu1 %v1491_v11  ;;  %v1655_v59 = vld [vmem:[#allocation8 + $0x38] sm:$0xff]  ;;  %v1654_v60 = vld [vmem:[#allocation8 + $0x30] sm:$0xff]  ;;  %v1653_v61 = vld [vmem:[#allocation8 + $0x28] sm:$0xff] }
  0x27   :  { %1777 = vmatpush.bf16.msra.mxu2 %v1491_v11  ;;  %1778 = vmatpush.bf16.msra.mxu3 %v1491_v11  ;;  %v2044_v63 = vld [vmem:[#allocation2 + $0x58] sm:$0xff]  ;;  %v2047_v2 = vld [vmem:[#allocation2 + $0x60] sm:$0xff]  ;;  %v1649_v3 = vld [vmem:[#allocation8 + $0x8] sm:$0xff] }
  0x28   :  { %v1651_v0 = vld [vmem:[#allocation8 + $0x18] sm:$0xff]  ;;  %v1650_v1 = vld [vmem:[#allocation8 + $0x10] sm:$0xff]  ;;  %v1648_v4 = vld [vmem:[#allocation8] sm:$0xff] }
  0x29   :  { %v1663_v5 = vld [vmem:[#allocation8 + $0x78] sm:$0xff]  ;;  %v2050_v6 = vld [vmem:[#allocation2 + $0x68] sm:$0xff]  ;;  %v1662_v7 = vld [vmem:[#allocation8 + $0x70] sm:$0xff] }
  0x2a   :  { %334 = vmatpush.bf16.msra.mxu0 %v1483_v14  ;;  %1779 = vmatpush.bf16.msra.mxu1 %v1483_v14  ;;  %v2053_v8 = vld [vmem:[#allocation7] sm:$0x3]  ;;  %v1661_v13 = vld [vmem:[#allocation8 + $0x68] sm:$0xff]  ;;  %v2074_v35 = vld [vmem:[#allocation2 + $0x78] sm:$0xff] }
  0x2b   :  { %1780 = vmatpush.bf16.msra.mxu2 %v1483_v14  ;;  %1781 = vmatpush.bf16.msra.mxu3 %v1483_v14  ;;  %v2056_v11 = vperm.slane %v2053_v8, 0  ;;  %v2060_v14 = vld [vmem:[#allocation2 + $0x70] sm:$0xff] }
  0x2c   :  { %v1658_v46 = vld [vmem:[#allocation8 + $0x50] sm:$0xff] }
  0x2e   :  { %335 = vmatpush.bf16.msra.mxu0 %v1475_v17  ;;  %1782 = vmatpush.bf16.msra.mxu1 %v1475_v17 }
  0x2f   :  { %1783 = vmatpush.bf16.msra.mxu2 %v1475_v17  ;;  %1784 = vmatpush.bf16.msra.mxu3 %v1475_v17 }
  0x32   :  { %336 = vmatpush.bf16.msra.mxu0 %v1467_v20  ;;  %1785 = vmatpush.bf16.msra.mxu1 %v1467_v20 }
  0x33   :  { %1786 = vmatpush.bf16.msra.mxu2 %v1467_v20  ;;  %1787 = vmatpush.bf16.msra.mxu3 %v1467_v20 }
  0x36   :  { %337 = vmatpush.bf16.msra.mxu0 %v1459_v25  ;;  %1788 = vmatpush.bf16.msra.mxu1 %v1459_v25 }
  0x37   :  { %1789 = vmatpush.bf16.msra.mxu2 %v1459_v25  ;;  %1790 = vmatpush.bf16.msra.mxu3 %v1459_v25  ;;  %v1660_v25 = vld [vmem:[#allocation8 + $0x60] sm:$0xff] }
  0x39   :  { %338 = vmatmul.bf16.vlgmr.msra.gmra.mxu0 %v1616_v29  ;;  %358 = vmatmul.bf16.vlgmr.msra.gmra.mxu1 %v2023_v30 }
  0x3a   :  { %419 = vmatpush.bf16.msrb.mxu1 %v1519_v26  ;;  %378 = vmatmul.bf16.vlgmr.msra.gmra.mxu2 %v2032_v54 }
  0x3b   :  { %864 = vmatpush.bf16.msrb.mxu2 %v1655_v59  ;;  %398 = vmatmul.bf16.vlgmr.msra.gmra.mxu3 %v2047_v2 }
  0x3c   :  { %953 = vmatpush.bf16.msrb.mxu3 %v1663_v5 }
  0x3e   :  { %420 = vmatpush.bf16.msrb.mxu1 %v1511_v31 }
  0x3f   :  { %865 = vmatpush.bf16.msrb.mxu2 %v1654_v60  ;;  %v1657_v60 = vld [vmem:[#allocation8 + $0x48] sm:$0xff] }
  0x40   :  { %954 = vmatpush.bf16.msrb.mxu3 %v1662_v7 }
  0x42   :  { %421 = vmatpush.bf16.msrb.mxu1 %v1503_v34  ;;  %v1659_v34 = vld [vmem:[#allocation8 + $0x58] sm:$0xff] }
  0x43   :  { %866 = vmatpush.bf16.msrb.mxu2 %v1653_v61 }
  0x44   :  { %955 = vmatpush.bf16.msrb.mxu3 %v1661_v13 }
  0x46   :  { %422 = vmatpush.bf16.msrb.mxu1 %v1495_v37 }
  0x47   :  { %867 = vmatpush.bf16.msrb.mxu2 %v1652_v62 }
  0x48   :  { %956 = vmatpush.bf16.msrb.mxu3 %v1660_v25 }
  0x49   :  { %343 = vmatmul.bf16.gmra.mxu0 %v1617_v43  ;;  %363 = vmatmul.bf16.gmra.mxu1 %v2026_v44 }
  0x4a   :  { %423 = vmatpush.bf16.msrb.mxu1 %v1487_v40  ;;  %383 = vmatmul.bf16.gmra.mxu2 %v2038_v57 }
  0x4b   :  { %868 = vmatpush.bf16.msrb.mxu2 %v1651_v0  ;;  %403 = vmatmul.bf16.gmra.mxu3 %v2050_v6 }
  0x4c   :  { %957 = vmatpush.bf16.msrb.mxu3 %v1659_v34 }
  0x4e   :  { %424 = vmatpush.bf16.msrb.mxu1 %v1479_v45 }
  0x4f   :  { %869 = vmatpush.bf16.msrb.mxu2 %v1650_v1 }
  0x50   :  { %958 = vmatpush.bf16.msrb.mxu3 %v1658_v46 }
  0x52   :  { %425 = vmatpush.bf16.msrb.mxu1 %v1471_v48 }
  0x53   :  { %870 = vmatpush.bf16.msrb.mxu2 %v1649_v3 }
  0x54   :  { %959 = vmatpush.bf16.msrb.mxu3 %v1657_v60 }
  0x56   :  { %426 = vmatpush.bf16.msrb.mxu1 %v1463_v51 }
  0x57   :  { %871 = vmatpush.bf16.msrb.mxu2 %v1648_v4 }
  0x59   :  { %348 = vmatmul.bf16.gmra.mxu0 %v1618_v52  ;;  %368 = vmatmul.bf16.gmra.mxu1 %v2029_v53 }
  0x5a   :  { %388 = vmatmul.bf16.gmra.mxu2 %v2041_v58 }
  0x5b   :  { %408 = vmatmul.bf16.gmra.mxu3 %v2060_v14 }
  0x69   :  { %353 = vmatmul.bf16.gmra.mxu0 %v1619_v55  ;;  %373 = vmatmul.bf16.gmra.mxu1 %v2035_v56 }
  0x6a   :  { %393 = vmatmul.bf16.gmra.mxu2 %v2044_v63 }
  0x6b   :  { %413 = vmatmul.bf16.gmra.mxu3 %v2074_v35 }
  0x79   :  { %427 = vmatmul.bf16.vlgmr.msrb.gmra.mxu1 %v1616_v29 }
  0x89   :  { %432 = vmatmul.bf16.gmra.mxu1 %v1617_v43 }
  0x99   :  { %437 = vmatmul.bf16.gmra.mxu1 %v1618_v52 }
  0xa9   :  { %442 = vmatmul.bf16.gmra.mxu1 %v1619_v55 }
  0xb6   :  { %v339_v9 = vpop.f32.mrf.mxu0  ;;  %v359_v10 = vpop.f32.mrf.mxu1 }
  0xb7   :  { %v340_v12 = vadd.f32 %v339_v9, %v2056_v11  ;;  %v360_v15 = vadd.f32 %v359_v10, %v2056_v11 }
  0xb9   :  { %447 = vmatmul.bf16.gmra.mxu1 %v2023_v30  ;;  %v572_v16 = vmul.f32 0.01, %v340_v12  ;;  %vm508_vm0 = vcmp.gt.f32.partialorder %v340_v12, 0.0  ;;  %v588_v19 = vmul.f32 0.01, %v360_v15  ;;  %vm524_vm1 = vcmp.gt.f32.partialorder %v360_v15, 0.0 }
  0xbb   :  { %v636_v24 = vsel %vm508_vm0, %v340_v12, %v572_v16  ;;  %v2066_v27 = vsel %vm524_vm1, %v360_v15, %v588_v19  ;;  %v1656_v12 = vld [vmem:[#allocation8 + $0x40] sm:$0xff] }
  0xbc   :  { %960 = vmatpush.bf16.msrb.mxu3 %v1656_v12 }
  0xbe   :  { %v341_v17 = vpop.f32.mrf.mxu0  ;;  %v361_v18 = vpop.f32.mrf.mxu1 }
  0xbf   :  { %v342_v20 = vadd.f32 %v341_v17, %v2056_v11  ;;  %v362_v21 = vadd.f32 %v361_v18, %v2056_v11 }
  0xc1   :  { %vm510_vm2 = vcmp.gt.f32.partialorder %v342_v20, 0.0  ;;  %v574_v22 = vmul.f32 0.01, %v342_v20  ;;  %v590_v23 = vmul.f32 0.01, %v362_v21  ;;  %vm526_vm3 = vcmp.gt.f32.partialorder %v362_v21, 0.0 }
  0xc3   :  { %v638_v26 = vsel %vm510_vm2, %v342_v20, %v574_v22  ;;  %v2068_v28 = vsel %vm526_vm3, %v362_v21, %v590_v23 }
  0xc4   :  { %v700_v29 = vpack.c.bf16 %v638_v26, %v636_v24  ;;  %v708_v30 = vpack.c.bf16 %v2068_v28, %v2066_v27 }
  0xc6   :  { %v344_v31 = vpop.f32.mrf.mxu0  ;;  %v364_v32 = vpop.f32.mrf.mxu1  ;;  %872 = vmatmul.bf16.vlgmr.msrb.gmra.mxu2 %v700_v29 }
  0xc7   :  { %v345_v33 = vadd.f32 %v344_v31, %v2056_v11  ;;  %v365_v36 = vadd.f32 %v364_v32, %v2056_v11 }
  0xc9   :  { %452 = vmatmul.bf16.gmra.mxu1 %v2026_v44  ;;  %v576_v37 = vmul.f32 0.01, %v345_v33  ;;  %vm512_vm4 = vcmp.gt.f32.partialorder %v345_v33, 0.0  ;;  %v592_v40 = vmul.f32 0.01, %v365_v36  ;;  %vm528_vm5 = vcmp.gt.f32.partialorder %v365_v36, 0.0 }
  0xcb   :  { %v640_v45 = vsel %vm512_vm4, %v345_v33, %v576_v37  ;;  %v2080_v48 = vsel %vm528_vm5, %v365_v36, %v592_v40  ;;  %v2109_v40 = vperm.slane %v2053_v8, 1 }
  0xce   :  { %v346_v38 = vpop.f32.mrf.mxu0  ;;  %v366_v39 = vpop.f32.mrf.mxu1 }
  0xcf   :  { %v347_v41 = vadd.f32 %v346_v38, %v2056_v11  ;;  %v367_v42 = vadd.f32 %v366_v39, %v2056_v11 }
  0xd1   :  { %v578_v43 = vmul.f32 0.01, %v347_v41  ;;  %v594_v44 = vmul.f32 0.01, %v367_v42  ;;  %vm514_vm6 = vcmp.gt.f32.partialorder %v347_v41, 0.0  ;;  %vm530_vm7 = vcmp.gt.f32.partialorder %v367_v42, 0.0 }
  0xd3   :  { %v642_v47 = vsel %vm514_vm6, %v347_v41, %v578_v43  ;;  %v2082_v49 = vsel %vm530_vm7, %v367_v42, %v594_v44  ;;  %v379_v41 = vpop.f32.mrf.mxu2 }
  0xd4   :  { %v702_v50 = vpack.c.bf16 %v642_v47, %v640_v45  ;;  %v710_v51 = vpack.c.bf16 %v2082_v49, %v2080_v48 }
  0xd6   :  { %v349_v52 = vpop.f32.mrf.mxu0  ;;  %v369_v55 = vpop.f32.mrf.mxu1  ;;  %877 = vmatmul.bf16.gmra.mxu2 %v702_v50 }
  0xd7   :  { %v350_v59 = vadd.f32 %v349_v52, %v2056_v11  ;;  %v370_v61 = vadd.f32 %v369_v55, %v2056_v11 }
  0xd9   :  { %457 = vmatmul.bf16.gmra.mxu1 %v2029_v53  ;;  %v580_v62 = vmul.f32 0.01, %v350_v59  ;;  %vm516_vm8 = vcmp.gt.f32.partialorder %v350_v59, 0.0  ;;  %v596_v3 = vmul.f32 0.01, %v370_v61  ;;  %vm532_vm9 = vcmp.gt.f32.partialorder %v370_v61, 0.0 }
  0xdb   :  { %v644_v10 = vsel %vm516_vm8, %v350_v59, %v580_v62  ;;  %v2091_v13 = vsel %vm532_vm9, %v370_v61, %v596_v3  ;;  %v381_v52 = vpop.f32.mrf.mxu2 }
  0xde   :  { %v351_v0 = vpop.f32.mrf.mxu0  ;;  %v371_v1 = vpop.f32.mrf.mxu1 }
  0xdf   :  { %v352_v4 = vadd.f32 %v351_v0, %v2056_v11  ;;  %v372_v5 = vadd.f32 %v371_v1, %v2056_v11 }
  0xe1   :  { %v582_v7 = vmul.f32 0.01, %v352_v4  ;;  %v598_v9 = vmul.f32 0.01, %v372_v5  ;;  %vm518_vm10 = vcmp.gt.f32.partialorder %v352_v4, 0.0  ;;  %vm534_vm11 = vcmp.gt.f32.partialorder %v372_v5, 0.0 }
  0xe3   :  { %v646_v53 = vsel %vm518_vm10, %v352_v4, %v582_v7  ;;  %v2093_v15 = vsel %vm534_vm11, %v372_v5, %v598_v9  ;;  %v2119_v8 = vpop.f32.mrf.mxu2 }
  0xe4   :  { %v704_v16 = vpack.c.bf16 %v646_v53, %v644_v10  ;;  %v712_v17 = vpack.c.bf16 %v2093_v15, %v2091_v13  ;;  %v382_v15 = vadd.f32 %v381_v52, %v2056_v11  ;;  %v1669_v52 = vld [vmem:[#allocation10 + $0x28] sm:$0xff] }
  0xe6   :  { %v354_v18 = vpop.f32.mrf.mxu0  ;;  %v374_v19 = vpop.f32.mrf.mxu1  ;;  %882 = vmatmul.bf16.gmra.mxu2 %v704_v16  ;;  %vm542_vm9 = vcmp.gt.f32.partialorder %v382_v15, 0.0 }
  0xe7   :  { %v355_v20 = vadd.f32 %v354_v18, %v2056_v11  ;;  %v375_v21 = vadd.f32 %v374_v19, %v2056_v11 }
  0xe9   :  { %462 = vmatmul.bf16.gmra.mxu1 %v2035_v56  ;;  %v584_v22 = vmul.f32 0.01, %v355_v20  ;;  %vm520_vm12 = vcmp.gt.f32.partialorder %v355_v20, 0.0  ;;  %v600_v25 = vmul.f32 0.01, %v375_v21  ;;  %vm536_vm13 = vcmp.gt.f32.partialorder %v375_v21, 0.0 }
  0xeb   :  { %v648_v31 = vsel %vm520_vm12, %v355_v20, %v584_v22  ;;  %v2102_v36 = vsel %vm536_vm13, %v375_v21, %v600_v25 }
  0xee   :  { %v356_v23 = vpop.f32.mrf.mxu0  ;;  %v376_v24 = vpop.f32.mrf.mxu1 }
  0xef   :  { %v357_v26 = vadd.f32 %v356_v23, %v2056_v11  ;;  %v377_v29 = vadd.f32 %v376_v24, %v2056_v11 }
  0xf1   :  { %v586_v32 = vmul.f32 0.01, %v357_v26  ;;  %v602_v33 = vmul.f32 0.01, %v377_v29  ;;  %vm522_vm14 = vcmp.gt.f32.partialorder %v357_v26, 0.0  ;;  %vm538_vm15 = vcmp.gt.f32.partialorder %v377_v29, 0.0 }
  0xf3   :  { %v650_v34 = vsel %vm522_vm14, %v357_v26, %v586_v32  ;;  %v2104_v56 = vsel %vm538_vm15, %v377_v29, %v602_v33  ;;  %v606_v26 = vmul.f32 0.01, %v382_v15 }
  0xf4   :  { %v706_v37 = vpack.c.bf16 %v650_v34, %v648_v31  ;;  %v714_v38 = vpack.c.bf16 %v2104_v56, %v2102_v36  ;;  %v2149_v31 = vpop.f32.mrf.mxu3 }
  0xf6   :  { %v428_v39 = vpop.f32.mrf.mxu1  ;;  %887 = vmatmul.bf16.gmra.mxu2 %v706_v37  ;;  %v670_v37 = vsel %vm542_vm9, %v382_v15, %v606_v26 }
  0xf7   :  { %v429_v42 = vadd.f32 %v428_v39, %v2109_v40  ;;  %v1670_v39 = vld [vmem:[#allocation10 + $0x30] sm:$0xff] }
  0xf9   :  { %467 = vmatmul.bf16.gmra.mxu1 %v2032_v54  ;;  %v573_v44 = vmul.f32 0.01, %v429_v42  ;;  %vm509_vm0 = vcmp.gt.f32.partialorder %v429_v42, 0.0 }
  0xfb   :  { %v637_v47 = vsel %vm509_vm0, %v429_v42, %v573_v44 }
  0xfc   :  { %v2154_v44 = vpop.f32.mrf.mxu3 }
  0xfe   :  { %v430_v43 = vpop.f32.mrf.mxu1 }
  0xff   :  { %v431_v45 = vadd.f32 %v430_v43, %v2109_v40 }
 0x101   :  { %vm511_vm1 = vcmp.gt.f32.partialorder %v431_v45, 0.0  ;;  %v575_v46 = vmul.f32 0.01, %v431_v45 }
 0x103   :  { %v639_v50 = vsel %vm511_vm1, %v431_v45, %v575_v46  ;;  %v385_v46 = vadd.f32 %v2119_v8, %v2056_v11 }
 0x104   :  { %v701_v55 = vpack.c.bf16 %v639_v50, %v637_v47  ;;  %v2165_v8 = vpop.f32.mrf.mxu3 }
 0x105   :  { %vm544_vm12 = vcmp.gt.f32.partialorder %v385_v46, 0.0 }
 0x106   :  { %v433_v59 = vpop.f32.mrf.mxu1  ;;  %892 = vmatmul.bf16.gmra.mxu2 %v708_v30  ;;  %961 = vmatmul.bf16.vlgmr.msrb.gmra.mxu3 %v701_v55  ;;  %v608_v55 = vmul.f32 0.01, %v385_v46 }
 0x107   :  { %v434_v54 = vadd.f32 %v433_v59, %v2109_v40 }
 0x109   :  { %472 = vmatmul.bf16.gmra.mxu1 %v2038_v57  ;;  %v577_v61 = vmul.f32 0.01, %v434_v54  ;;  %vm513_vm2 = vcmp.gt.f32.partialorder %v434_v54, 0.0  ;;  %v2125_v57 = vpop.f32.mrf.mxu2 }
 0x10a   :  { %v387_v47 = vadd.f32 %v2125_v57, %v2056_v11 }
 0x10b   :  { %v641_v1 = vsel %vm513_vm2, %v434_v54, %v577_v61 }
 0x10c   :  { %v610_v59 = vmul.f32 0.01, %v387_v47  ;;  %vm546_vm13 = vcmp.gt.f32.partialorder %v387_v47, 0.0 }
 0x10e   :  { %v435_v60 = vpop.f32.mrf.mxu1 }
 0x10f   :  { %v436_v62 = vadd.f32 %v435_v60, %v2109_v40 }
 0x111   :  { %v579_v0 = vmul.f32 0.01, %v436_v62  ;;  %vm515_vm3 = vcmp.gt.f32.partialorder %v436_v62, 0.0  ;;  %v2130_v10 = vpop.f32.mrf.mxu2 }
 0x113   :  { %v643_v3 = vsel %vm515_vm3, %v436_v62, %v579_v0  ;;  %v672_v0 = vsel %vm544_vm12, %v385_v46, %v608_v55 }
 0x114   :  { %v703_v4 = vpack.c.bf16 %v643_v3, %v641_v1  ;;  %v674_v1 = vsel %vm546_vm13, %v387_v47, %v610_v59  ;;  %v1664_v47 = vld [vmem:[#allocation10] sm:$0xff]  ;;  %v400_v59 = vadd.f32 %v2149_v31, %v2056_v11 }
 0x116   :  { %v438_v5 = vpop.f32.mrf.mxu1  ;;  %897 = vmatmul.bf16.gmra.mxu2 %v710_v51  ;;  %966 = vmatmul.bf16.gmra.mxu3 %v703_v4  ;;  %v718_v4 = vpack.c.bf16 %v674_v1, %v672_v0 }
 0x117   :  { %v439_v27 = vadd.f32 %v438_v5, %v2109_v40  ;;  %v1668_v5 = vld [vmem:[#allocation10 + $0x20] sm:$0xff] }
 0x119   :  { %477 = vmatmul.bf16.gmra.mxu1 %v2041_v58  ;;  %v581_v30 = vmul.f32 0.01, %v439_v27  ;;  %vm517_vm4 = vcmp.gt.f32.partialorder %v439_v27, 0.0  ;;  %v2137_v51 = vpop.f32.mrf.mxu2 }
 0x11b   :  { %v645_v12 = vsel %vm517_vm4, %v439_v27, %v581_v30 }
 0x11e   :  { %v440_v28 = vpop.f32.mrf.mxu1 }
 0x11f   :  { %v441_v7 = vadd.f32 %v440_v28, %v2109_v40 }
 0x121   :  { %v583_v9 = vmul.f32 0.01, %v441_v7  ;;  %vm519_vm5 = vcmp.gt.f32.partialorder %v441_v7, 0.0  ;;  %v2140_v24 = vpop.f32.mrf.mxu2 }
 0x122   :  { %v395_v26 = vadd.f32 %v2140_v24, %v2056_v11 }
 0x123   :  { %v647_v53 = vsel %vm519_vm5, %v441_v7, %v583_v9  ;;  %v390_v7 = vadd.f32 %v2130_v10, %v2056_v11  ;;  %v392_v9 = vadd.f32 %v2137_v51, %v2056_v11 }
 0x124   :  { %v705_v48 = vpack.c.bf16 %v647_v53, %v645_v12  ;;  %v2173_v12 = vpop.f32.mrf.mxu3  ;;  %v1667_v53 = vld [vmem:[#allocation10 + $0x18] sm:$0xff]  ;;  %vm552_vm4 = vcmp.gt.f32.partialorder %v395_v26, 0.0 }
 0x125   :  { %vm548_vm0 = vcmp.gt.f32.partialorder %v390_v7, 0.0  ;;  %vm550_vm1 = vcmp.gt.f32.partialorder %v392_v9, 0.0 }
 0x126   :  { %v443_v49 = vpop.f32.mrf.mxu1  ;;  %902 = vmatmul.bf16.gmra.mxu2 %v712_v17  ;;  %971 = vmatmul.bf16.gmra.mxu3 %v705_v48  ;;  %v1671_v17 = vld [vmem:[#allocation10 + $0x38] sm:$0xff]  ;;  %v612_v48 = vmul.f32 0.01, %v390_v7 }
 0x127   :  { %v444_v58 = vadd.f32 %v443_v49, %v2109_v40  ;;  %1218 = vmatpush.bf16.msrb.mxu0 %v1671_v17  ;;  %v614_v49 = vmul.f32 0.01, %v392_v9 }
 0x129   :  { %482 = vmatmul.bf16.gmra.mxu1 %v2044_v63  ;;  %v585_v18 = vmul.f32 0.01, %v444_v58  ;;  %vm521_vm6 = vcmp.gt.f32.partialorder %v444_v58, 0.0  ;;  %v380_v63 = vadd.f32 %v379_v41, %v2056_v11  ;;  %v2152_v36 = vpop.f32.mrf.mxu2  ;;  %v678_v51 = vsel %vm550_vm1, %v392_v9, %v614_v49 }
 0x12a   :  { %v405_v49 = vadd.f32 %v2165_v8, %v2056_v11 }
 0x12b   :  { %v649_v21 = vsel %vm521_vm6, %v444_v58, %v585_v18  ;;  %v604_v25 = vmul.f32 0.01, %v380_v63  ;;  %vm540_vm8 = vcmp.gt.f32.partialorder %v380_v63, 0.0  ;;  %1219 = vmatpush.bf16.msrb.mxu0 %v1670_v39 }
 0x12c   :  { %vm560_vm12 = vcmp.gt.f32.partialorder %v405_v49, 0.0 }
 0x12d   :  { %v668_v56 = vsel %vm540_vm8, %v380_v63, %v604_v25  ;;  %vm556_vm8 = vcmp.gt.f32.partialorder %v400_v59, 0.0 }
 0x12e   :  { %v445_v16 = vpop.f32.mrf.mxu1 }
 0x12f   :  { %v446_v19 = vadd.f32 %v445_v16, %v2109_v40  ;;  %1220 = vmatpush.bf16.msrb.mxu0 %v1669_v52 }
 0x131   :  { %v587_v20 = vmul.f32 0.01, %v446_v19  ;;  %vm523_vm7 = vcmp.gt.f32.partialorder %v446_v19, 0.0 }
 0x133   :  { %v651_v22 = vsel %vm523_vm7, %v446_v19, %v587_v20  ;;  %1221 = vmatpush.bf16.msrb.mxu0 %v1668_v5  ;;  %v676_v20 = vsel %vm548_vm0, %v390_v7, %v612_v48  ;;  %v2212_v48 = vld [vmem:[%s2313_s4] ss:$0 sm:$0xff]  ;;  %s1963_s4 = smov [#allocation11]  }
 0x134   :  { %v707_v23 = vpack.c.bf16 %v651_v22, %v649_v21  ;;  %v1666_v22 = vld [vmem:[#allocation10 + $0x10] sm:$0xff]  ;;  %s1375_s23 = sshll.u32 %s1963_s4, 4  ;;  %s1376_s23 = int_to_ptr.vmem [resolvable:$true] %s1375_s23 }
 0x136   :  { %v448_v13 = vpop.f32.mrf.mxu1  ;;  %907 = vmatmul.bf16.gmra.mxu2 %v714_v38  ;;  %976 = vmatmul.bf16.gmra.mxu3 %v707_v23  ;;  %v716_v38 = vpack.c.bf16 %v670_v37, %v668_v56  ;;  %v2180_v23 = vpop.f32.mrf.mxu3  ;;  %v1665_v56 = vld [vmem:[#allocation10 + $0x8] sm:$0xff] }
 0x137   :  { %v449_v29 = vadd.f32 %v448_v13, %v2109_v40  ;;  %1222 = vmatpush.bf16.msrb.mxu0 %v1667_v53 }
 0x139   :  { %487 = vmatmul.bf16.gmra.mxu1 %v2047_v2  ;;  %v589_v33 = vmul.f32 0.01, %v449_v29  ;;  %vm525_vm10 = vcmp.gt.f32.partialorder %v449_v29, 0.0 }
 0x13b   :  { %v653_v41 = vsel %vm525_vm10, %v449_v29, %v589_v33  ;;  %1223 = vmatpush.bf16.msrb.mxu0 %v1666_v22  ;;  %v397_v29 = vadd.f32 %v2152_v36, %v2056_v11 }
 0x13d   :  { %v618_v33 = vmul.f32 0.01, %v397_v29  ;;  %vm554_vm5 = vcmp.gt.f32.partialorder %v397_v29, 0.0 }
 0x13e   :  { %v450_v32 = vpop.f32.mrf.mxu1  ;;  %v2190_v37 = vpop.f32.mrf.mxu3 }
 0x13f   :  { %v451_v34 = vadd.f32 %v450_v32, %v2109_v40  ;;  %v616_v32 = vmul.f32 0.01, %v395_v26  ;;  %1224 = vmatpush.bf16.msrb.mxu0 %v1665_v56  ;;  %v682_v36 = vsel %vm554_vm5, %v397_v29, %v618_v33 }
 0x141   :  { %v591_v2 = vmul.f32 0.01, %v451_v34  ;;  %vm527_vm11 = vcmp.gt.f32.partialorder %v451_v34, 0.0 }
 0x143   :  { %v655_v42 = vsel %vm527_vm11, %v451_v34, %v591_v2  ;;  %1225 = vmatpush.bf16.msrb.mxu0 %v1664_v47 }
 0x144   :  { %v709_v43 = vpack.c.bf16 %v655_v42, %v653_v41  ;;  %v680_v41 = vsel %vm552_vm4, %v395_v26, %v616_v32 }
 0x145   :  { %v722_v42 = vpack.c.bf16 %v682_v36, %v680_v41 }
 0x146   :  { %v453_v45 = vpop.f32.mrf.mxu1  ;;  %912 = vmatmul.bf16.gmra.mxu2 %v716_v38  ;;  %981 = vmatmul.bf16.gmra.mxu3 %v709_v43  ;;  %v2195_v55 = vpop.f32.mrf.mxu3 }
 0x147   :  { %v454_v54 = vadd.f32 %v453_v45, %v2109_v40 }
 0x149   :  { %492 = vmatmul.bf16.gmra.mxu1 %v2050_v6  ;;  %v2161_v50 = vpop.f32.mrf.mxu2  ;;  %v593_v61 = vmul.f32 0.01, %v454_v54  ;;  %vm529_vm14 = vcmp.gt.f32.partialorder %v454_v54, 0.0 }
 0x14b   :  { %v657_v57 = vsel %vm529_vm14, %v454_v54, %v593_v61  ;;  %v402_v54 = vadd.f32 %v2154_v44, %v2056_v11 }
 0x14d   :  { %v622_v0 = vmul.f32 0.01, %v402_v54  ;;  %vm558_vm9 = vcmp.gt.f32.partialorder %v402_v54, 0.0 }
 0x14e   :  { %v455_v60 = vpop.f32.mrf.mxu1  ;;  %v2205_v5 = vpop.f32.mrf.mxu3 }
 0x14f   :  { %v456_v62 = vadd.f32 %v455_v60, %v2109_v40 }
 0x151   :  { %v595_v6 = vmul.f32 0.01, %v456_v62  ;;  %v2167_v3 = vpop.f32.mrf.mxu2  ;;  %vm531_vm15 = vcmp.gt.f32.partialorder %v456_v62, 0.0 }
 0x153   :  { %v659_v27 = vsel %vm531_vm15, %v456_v62, %v595_v6  ;;  %v620_v62 = vmul.f32 0.01, %v400_v59 }
 0x154   :  { %v711_v28 = vpack.c.bf16 %v659_v27, %v657_v57  ;;  %v686_v27 = vsel %vm558_vm9, %v402_v54, %v622_v0 }
 0x155   :  { %v684_v57 = vsel %vm556_vm8, %v400_v59, %v620_v62 }
 0x156   :  { %v458_v30 = vpop.f32.mrf.mxu1  ;;  %917 = vmatmul.bf16.gmra.mxu2 %v718_v4  ;;  %986 = vmatmul.bf16.gmra.mxu3 %v711_v28  ;;  %v724_v7 = vpack.c.bf16 %v686_v27, %v684_v57 }
 0x157   :  { %v459_v58 = vadd.f32 %v458_v30, %v2109_v40 }
 0x159   :  { %497 = vmatmul.bf16.gmra.mxu1 %v2060_v14  ;;  %v2177_v16 = vpop.f32.mrf.mxu2  ;;  %v597_v19 = vmul.f32 0.01, %v459_v58  ;;  %vm533_vm2 = vcmp.gt.f32.partialorder %v459_v58, 0.0  ;;  %v720_v14 = vpack.c.bf16 %v678_v51, %v676_v20  ;;  %v624_v20 = vmul.f32 0.01, %v405_v49 }
 0x15b   :  { %v661_v13 = vsel %vm533_vm2, %v459_v58, %v597_v19  ;;  %v407_v58 = vadd.f32 %v2173_v12, %v2056_v11  ;;  %v876_v12 = vadd.f32 %v2212_v48, %v2167_v3 }
 0x15d   :  { %v626_v51 = vmul.f32 0.01, %v407_v58  ;;  %vm562_vm13 = vcmp.gt.f32.partialorder %v407_v58, 0.0 }
 0x15e   :  { %v460_v18 = vpop.f32.mrf.mxu1 }
 0x15f   :  { %v461_v10 = vadd.f32 %v460_v18, %v2109_v40 }
 0x161   :  { %v599_v21 = vmul.f32 0.01, %v461_v10  ;;  %vm535_vm3 = vcmp.gt.f32.partialorder %v461_v10, 0.0  ;;  %v2182_v17 = vpop.f32.mrf.mxu2 }
 0x163   :  { %v663_v63 = vsel %vm535_vm3, %v461_v10, %v599_v21  ;;  %v874_v10 = vadd.f32 %v2212_v48, %v2161_v50  ;;  %v690_v50 = vsel %vm562_vm13, %v407_v58, %v626_v51  ;;  %v415_v58 = vadd.f32 %v2195_v55, %v2056_v11 }
 0x164   :  { %v713_v15 = vpack.c.bf16 %v663_v63, %v661_v13 }
 0x165   :  { %vm568_vm8 = vcmp.gt.f32.partialorder %v415_v58, 0.0 }
 0x166   :  { %v463_v25 = vpop.f32.mrf.mxu1  ;;  %922 = vmatmul.bf16.gmra.mxu2 %v720_v14  ;;  %991 = vmatmul.bf16.gmra.mxu3 %v713_v15 }
 0x167   :  { %v464_v34 = vadd.f32 %v463_v25, %v2109_v40  ;;  %v688_v25 = vsel %vm560_vm12, %v405_v49, %v624_v20 }
 0x168   :  { %v726_v56 = vpack.c.bf16 %v690_v50, %v688_v25 }
 0x169   :  { %502 = vmatmul.bf16.gmra.mxu1 %v2074_v35  ;;  %v601_v38 = vmul.f32 0.01, %v464_v34  ;;  %v2192_v39 = vpop.f32.mrf.mxu2  ;;  %vm537_vm6 = vcmp.gt.f32.partialorder %v464_v34, 0.0 }
 0x16a   :  { %v884_v51 = vadd.f32 %v2212_v48, %v2192_v39 }
 0x16b   :  { %v665_v43 = vsel %vm537_vm6, %v464_v34, %v601_v38 }
 0x16e   :  { %v465_v2 = vpop.f32.mrf.mxu1 }
 0x16f   :  { %v466_v24 = vadd.f32 %v465_v2, %v2109_v40 }
 0x171   :  { %v603_v35 = vmul.f32 0.01, %v466_v24  ;;  %vm539_vm7 = vcmp.gt.f32.partialorder %v466_v24, 0.0  ;;  %v2201_v60 = vpop.f32.mrf.mxu2 }
 0x173   :  { %v667_v45 = vsel %vm539_vm7, %v466_v24, %v603_v35  ;;  %v410_v35 = vadd.f32 %v2180_v23, %v2056_v11  ;;  %v881_v23 = vadd.f32 %v2212_v48, %v2182_v17 }
 0x174   :  { %v715_v46 = vpack.c.bf16 %v667_v45, %v665_v43 }
 0x175   :  { %v628_v47 = vmul.f32 0.01, %v410_v35  ;;  %vm564_vm2 = vcmp.gt.f32.partialorder %v410_v35, 0.0 }
 0x176   :  { %v468_v52 = vpop.f32.mrf.mxu1  ;;  %927 = vmatmul.bf16.gmra.mxu2 %v722_v42  ;;  %996 = vmatmul.bf16.gmra.mxu3 %v715_v46  ;;  %v412_v42 = vadd.f32 %v2190_v37, %v2056_v11  ;;  %v879_v46 = vadd.f32 %v2212_v48, %v2177_v16 }
 0x177   :  { %v469_v61 = vadd.f32 %v468_v52, %v2109_v40 }
 0x178   :  { %v630_v52 = vmul.f32 0.01, %v412_v42  ;;  %vm566_vm3 = vcmp.gt.f32.partialorder %v412_v42, 0.0 }
 0x179   :  { %v605_v6 = vmul.f32 0.01, %v469_v61  ;;  %vm541_vm10 = vcmp.gt.f32.partialorder %v469_v61, 0.0  ;;  %v2207_v44 = vpop.f32.mrf.mxu2 }
 0x17a   :  { %v694_v16 = vsel %vm566_vm3, %v412_v42, %v630_v52 }
 0x17b   :  { %v669_v28 = vsel %vm541_vm10, %v469_v61, %v605_v6  ;;  %v692_v6 = vsel %vm564_vm2, %v410_v35, %v628_v47  ;;  %v889_v35 = vadd.f32 %v2212_v48, %v2207_v44 }
 0x17e   :  { %v470_v1 = vpop.f32.mrf.mxu1 }
 0x17f   :  { %v471_v4 = vadd.f32 %v470_v1, %v2109_v40 }
 0x181   :  { %vm543_vm11 = vcmp.gt.f32.partialorder %v471_v4, 0.0  ;;  %v607_v31 = vmul.f32 0.01, %v471_v4  ;;  %v2221_v21 = vpop.f32.mrf.mxu2 }
 0x182   :  { %v891_v52 = vadd.f32 %v2212_v48, %v2221_v21 }
 0x183   :  { %v671_v30 = vsel %vm543_vm11, %v471_v4, %v607_v31 }
 0x184   :  { %v717_v9 = vpack.c.bf16 %v671_v30, %v669_v28  ;;  %v728_v30 = vpack.c.bf16 %v694_v16, %v692_v6 }
 0x186   :  { %v473_v53 = vpop.f32.mrf.mxu1  ;;  %932 = vmatmul.bf16.gmra.mxu2 %v724_v7  ;;  %1001 = vmatmul.bf16.gmra.mxu3 %v717_v9 }
 0x187   :  { %v474_v19 = vadd.f32 %v473_v53, %v2109_v40 }
 0x189   :  { %v962_v18 = vpop.f32.mrf.mxu3  ;;  %v609_v13 = vmul.f32 0.01, %v474_v19  ;;  %vm545_vm14 = vcmp.gt.f32.partialorder %v474_v19, 0.0  ;;  %v2226_v41 = vpop.f32.mrf.mxu2 }
 0x18a   :  { %v963_v14 = vadd.f32 %v962_v18, %v874_v10  ;;  %v417_v18 = vadd.f32 %v2205_v5, %v2056_v11  ;;  %v886_v11 = vadd.f32 %v2212_v48, %v2201_v60 }
 0x18b   :  { %v673_v32 = vsel %vm545_vm14, %v474_v19, %v609_v13 }
 0x18c   :  { %v1074_v26 = vmul.f32 0.01, %v963_v14  ;;  %vm1042_vm0 = vcmp.gt.f32.partialorder %v963_v14, 0.0  ;;  %vm570_vm9 = vcmp.gt.f32.partialorder %v417_v18, 0.0 }
 0x18e   :  { %v475_v22 = vpop.f32.mrf.mxu1  ;;  %v1106_v24 = vsel %vm1042_vm0, %v963_v14, %v1074_v26  ;;  %v632_v14 = vmul.f32 0.01, %v415_v58 }
 0x18f   :  { %v476_v8 = vadd.f32 %v475_v22, %v2109_v40  ;;  %v634_v22 = vmul.f32 0.01, %v417_v18 }
 0x191   :  { %vm547_vm15 = vcmp.gt.f32.partialorder %v476_v8, 0.0  ;;  %v611_v63 = vmul.f32 0.01, %v476_v8  ;;  %v964_v15 = vpop.f32.mrf.mxu3  ;;  %v2238_v37 = vpop.f32.mrf.mxu2  ;;  %v698_v25 = vsel %vm570_vm9, %v417_v18, %v634_v22 }
 0x192   :  { %v965_v29 = vadd.f32 %v964_v15, %v876_v12  ;;  %v696_v15 = vsel %vm568_vm8, %v415_v58, %v632_v14 }
 0x193   :  { %v675_v33 = vsel %vm547_vm15, %v476_v8, %v611_v63 }
 0x194   :  { %vm1043_vm1 = vcmp.gt.f32.partialorder %v965_v29, 0.0  ;;  %v1075_v34 = vmul.f32 0.01, %v965_v29  ;;  %v719_v2 = vpack.c.bf16 %v675_v33, %v673_v32  ;;  %v730_v33 = vpack.c.bf16 %v698_v25, %v696_v15 }
 0x196   :  { %v478_v38 = vpop.f32.mrf.mxu1  ;;  %937 = vmatmul.bf16.gmra.mxu2 %v726_v56  ;;  %1006 = vmatmul.bf16.gmra.mxu3 %v719_v2  ;;  %v1107_v3 = vsel %vm1043_vm1, %v965_v29, %v1075_v34 }
 0x197   :  { %v1138_v36 = vpack.c.bf16 %v1107_v3, %v1106_v24  ;;  %v479_v45 = vadd.f32 %v478_v38, %v2109_v40 }
 0x199   :  { %v967_v43 = vpop.f32.mrf.mxu3  ;;  %1226 = vmatmul.bf16.vlgmr.msrb.gmra.mxu0 %v1138_v36  ;;  %v613_v61 = vmul.f32 0.01, %v479_v45  ;;  %vm549_vm4 = vcmp.gt.f32.partialorder %v479_v45, 0.0  ;;  %v2244_v10 = vpop.f32.mrf.mxu2 }
 0x19a   :  { %v968_v59 = vadd.f32 %v967_v43, %v879_v46 }
 0x19b   :  { %v677_v57 = vsel %vm549_vm4, %v479_v45, %v613_v61 }
 0x19c   :  { %v1076_v4 = vmul.f32 0.01, %v968_v59  ;;  %vm1044_vm6 = vcmp.gt.f32.partialorder %v968_v59, 0.0 }
 0x19e   :  { %v480_v54 = vpop.f32.mrf.mxu1  ;;  %v1108_v17 = vsel %vm1044_vm6, %v968_v59, %v1076_v4 }
 0x19f   :  { %v481_v62 = vadd.f32 %v480_v54, %v2109_v40 }
 0x1a1   :  { %vm551_vm5 = vcmp.gt.f32.partialorder %v481_v62, 0.0  ;;  %v615_v0 = vmul.f32 0.01, %v481_v62  ;;  %v969_v1 = vpop.f32.mrf.mxu3  ;;  %v2252_v56 = vpop.f32.mrf.mxu2 }
 0x1a2   :  { %v970_v31 = vadd.f32 %v969_v1, %v881_v23 }
 0x1a3   :  { %v679_v27 = vsel %vm551_vm5, %v481_v62, %v615_v0 }
 0x1a4   :  { %v1077_v28 = vmul.f32 0.01, %v970_v31  ;;  %v721_v7 = vpack.c.bf16 %v679_v27, %v677_v57  ;;  %vm1045_vm7 = vcmp.gt.f32.partialorder %v970_v31, 0.0 }
 0x1a6   :  { %v483_v9 = vpop.f32.mrf.mxu1  ;;  %942 = vmatmul.bf16.gmra.mxu2 %v728_v30  ;;  %1011 = vmatmul.bf16.gmra.mxu3 %v721_v7  ;;  %v1109_v53 = vsel %vm1045_vm7, %v970_v31, %v1077_v28  ;;  %v894_v28 = vadd.f32 %v2212_v48, %v2226_v41 }
 0x1a7   :  { %v1139_v49 = vpack.c.bf16 %v1109_v53, %v1108_v17  ;;  %v484_v20 = vadd.f32 %v483_v9, %v2109_v40  ;;  %v896_v53 = vadd.f32 %v2212_v48, %v2238_v37 }
 0x1a9   :  { %v972_v19 = vpop.f32.mrf.mxu3  ;;  %1231 = vmatmul.bf16.gmra.mxu0 %v1139_v49  ;;  %v617_v12 = vmul.f32 0.01, %v484_v20  ;;  %vm553_vm10 = vcmp.gt.f32.partialorder %v484_v20, 0.0  ;;  %v2257_v45 = vpop.f32.mrf.mxu2 }
 0x1aa   :  { %v973_v13 = vadd.f32 %v972_v19, %v884_v51 }
 0x1ab   :  { %v681_v26 = vsel %vm553_vm10, %v484_v20, %v617_v12 }
 0x1ac   :  { %v1078_v50 = vmul.f32 0.01, %v973_v13  ;;  %vm1046_vm12 = vcmp.gt.f32.partialorder %v973_v13, 0.0 }
 0x1ae   :  { %v485_v8 = vpop.f32.mrf.mxu1  ;;  %v1110_v60 = vsel %vm1046_vm12, %v973_v13, %v1078_v50 }
 0x1af   :  { %v486_v55 = vadd.f32 %v485_v8, %v2109_v40 }
 0x1b1   :  { %vm555_vm11 = vcmp.gt.f32.partialorder %v486_v55, 0.0  ;;  %v619_v5 = vmul.f32 0.01, %v486_v55  ;;  %v974_v63 = vpop.f32.mrf.mxu3  ;;  %v2262_v57 = vpop.f32.mrf.mxu2 }
 0x1b2   :  { %v975_v39 = vadd.f32 %v974_v63, %v886_v11 }
 0x1b3   :  { %v683_v29 = vsel %vm555_vm11, %v486_v55, %v619_v5  ;;  %v899_v5 = vadd.f32 %v2212_v48, %v2244_v10 }
 0x1b4   :  { %v1079_v32 = vmul.f32 0.01, %v975_v39  ;;  %v723_v34 = vpack.c.bf16 %v683_v29, %v681_v26  ;;  %vm1047_vm13 = vcmp.gt.f32.partialorder %v975_v39, 0.0  ;;  %v901_v26 = vadd.f32 %v2212_v48, %v2252_v56 }
 0x1b6   :  { %v488_v2 = vpop.f32.mrf.mxu1  ;;  %947 = vmatmul.bf16.gmra.mxu2 %v730_v33  ;;  %1016 = vmatmul.bf16.gmra.mxu3 %v723_v34  ;;  %v1111_v38 = vsel %vm1047_vm13, %v975_v39, %v1079_v32 }
 0x1b7   :  { %v1140_v24 = vpack.c.bf16 %v1111_v38, %v1110_v60  ;;  %v489_v36 = vadd.f32 %v488_v2, %v2109_v40 }
 0x1b9   :  { %v977_v3 = vpop.f32.mrf.mxu3  ;;  %1236 = vmatmul.bf16.gmra.mxu0 %v1140_v24  ;;  %v621_v46 = vmul.f32 0.01, %v489_v36  ;;  %vm557_vm14 = vcmp.gt.f32.partialorder %v489_v36, 0.0  ;;  %v2270_v20 = vpop.f32.mrf.mxu2 }
 0x1ba   :  { %v978_v42 = vadd.f32 %v977_v3, %v889_v35 }
 0x1bb   :  { %v685_v23 = vsel %vm557_vm14, %v489_v36, %v621_v46  ;;  %v904_v46 = vadd.f32 %v2212_v48, %v2257_v45 }
 0x1bc   :  { %v1080_v61 = vmul.f32 0.01, %v978_v42  ;;  %vm1048_vm0 = vcmp.gt.f32.partialorder %v978_v42, 0.0 }
 0x1be   :  { %v490_v43 = vpop.f32.mrf.mxu1  ;;  %v1112_v16 = vsel %vm1048_vm0, %v978_v42, %v1080_v61  ;;  %v906_v61 = vadd.f32 %v2212_v48, %v2262_v57 }
 0x1bf   :  { %v491_v47 = vadd.f32 %v490_v43, %v2109_v40 }
 0x1c1   :  { %vm559_vm15 = vcmp.gt.f32.partialorder %v491_v47, 0.0  ;;  %v623_v59 = vmul.f32 0.01, %v491_v47  ;;  %v979_v54 = vpop.f32.mrf.mxu3  ;;  %v910_v63 = vpop.f32.mrf.mxu2 }
 0x1c2   :  { %v980_v62 = vadd.f32 %v979_v54, %v891_v52 }
 0x1c3   :  { %v687_v0 = vsel %vm559_vm15, %v491_v47, %v623_v59 }
 0x1c4   :  { %v1081_v44 = vmul.f32 0.01, %v980_v62  ;;  %v725_v1 = vpack.c.bf16 %v687_v0, %v685_v23  ;;  %vm1049_vm1 = vcmp.gt.f32.partialorder %v980_v62, 0.0 }
 0x1c6   :  { %v493_v6 = vpop.f32.mrf.mxu1  ;;  %1021 = vmatmul.bf16.gmra.mxu3 %v725_v1  ;;  %v1113_v4 = vsel %vm1049_vm1, %v980_v62, %v1081_v44 }
 0x1c7   :  { %v1141_v31 = vpack.c.bf16 %v1113_v4, %v1112_v16  ;;  %v494_v27 = vadd.f32 %v493_v6, %v2109_v40 }
 0x1c9   :  { %v982_v21 = vpop.f32.mrf.mxu3  ;;  %1241 = vmatmul.bf16.gmra.mxu0 %v1141_v31  ;;  %v625_v9 = vmul.f32 0.01, %v494_v27  ;;  %vm561_vm2 = vcmp.gt.f32.partialorder %v494_v27, 0.0  ;;  %v913_v35 = vpop.f32.mrf.mxu2 }
 0x1ca   :  { %v983_v30 = vadd.f32 %v982_v21, %v894_v28  ;;  %v909_v28 = vadd.f32 %v2212_v48, %v2270_v20 }
 0x1cb   :  { %v689_v51 = vsel %vm561_vm2, %v494_v27, %v625_v9 }
 0x1cc   :  { %v1082_v18 = vmul.f32 0.01, %v983_v30  ;;  %vm1050_vm4 = vcmp.gt.f32.partialorder %v983_v30, 0.0 }
 0x1ce   :  { %v495_v7 = vpop.f32.mrf.mxu1  ;;  %v1114_v8 = vsel %vm1050_vm4, %v983_v30, %v1082_v18 }
 0x1cf   :  { %v496_v17 = vadd.f32 %v495_v7, %v2109_v40  ;;  %v911_v7 = vadd.f32 %v2212_v48, %v910_v63 }
 0x1d1   :  { %vm563_vm3 = vcmp.gt.f32.partialorder %v496_v17, 0.0  ;;  %v627_v49 = vmul.f32 0.01, %v496_v17  ;;  %v984_v58 = vpop.f32.mrf.mxu3  ;;  %v915_v62 = vpop.f32.mrf.mxu2 }
 0x1d2   :  { %v985_v19 = vadd.f32 %v984_v58, %v896_v53  ;;  %v916_v20 = vadd.f32 %v2212_v48, %v915_v62 }
 0x1d3   :  { %v691_v14 = vsel %vm563_vm3, %v496_v17, %v627_v49 }
 0x1d4   :  { %v1083_v41 = vmul.f32 0.01, %v985_v19  ;;  %v727_v22 = vpack.c.bf16 %v691_v14, %v689_v51  ;;  %vm1051_vm5 = vcmp.gt.f32.partialorder %v985_v19, 0.0 }
 0x1d6   :  { %v498_v13 = vpop.f32.mrf.mxu1  ;;  %1026 = vmatmul.bf16.gmra.mxu3 %v727_v22  ;;  %v1115_v12 = vsel %vm1051_vm5, %v985_v19, %v1083_v41  ;;  %v914_v41 = vadd.f32 %v2212_v48, %v913_v35 }
 0x1d7   :  { %v1142_v55 = vpack.c.bf16 %v1115_v12, %v1114_v8  ;;  %v499_v11 = vadd.f32 %v498_v13, %v2109_v40 }
 0x1d9   :  { %v987_v37 = vpop.f32.mrf.mxu3  ;;  %1246 = vmatmul.bf16.gmra.mxu0 %v1142_v55  ;;  %v629_v50 = vmul.f32 0.01, %v499_v11  ;;  %vm565_vm6 = vcmp.gt.f32.partialorder %v499_v11, 0.0  ;;  %v918_v57 = vpop.f32.mrf.mxu2 }
 0x1da   :  { %v988_v15 = vadd.f32 %v987_v37, %v899_v5 }
 0x1db   :  { %v693_v2 = vsel %vm565_vm6, %v499_v11, %v629_v50 }
 0x1dc   :  { %v1084_v33 = vmul.f32 0.01, %v988_v15  ;;  %vm1052_vm8 = vcmp.gt.f32.partialorder %v988_v15, 0.0 }
 0x1de   :  { %v500_v25 = vpop.f32.mrf.mxu1  ;;  %v1116_v3 = vsel %vm1052_vm8, %v988_v15, %v1084_v33 }
 0x1df   :  { %v501_v39 = vadd.f32 %v500_v25, %v2109_v40 }
 0x1e1   :  { %vm567_vm7 = vcmp.gt.f32.partialorder %v501_v39, 0.0  ;;  %v631_v29 = vmul.f32 0.01, %v501_v39  ;;  %v989_v32 = vpop.f32.mrf.mxu3  ;;  %v920_v58 = vpop.f32.mrf.mxu2 }
 0x1e2   :  { %v990_v34 = vadd.f32 %v989_v32, %v901_v26  ;;  %v921_v33 = vadd.f32 %v2212_v48, %v920_v58 }
 0x1e3   :  { %v695_v60 = vsel %vm567_vm7, %v501_v39, %v631_v29  ;;  %v919_v39 = vadd.f32 %v2212_v48, %v918_v57 }
 0x1e4   :  { %v1085_v38 = vmul.f32 0.01, %v990_v34  ;;  %v729_v10 = vpack.c.bf16 %v695_v60, %v693_v2  ;;  %vm1053_vm9 = vcmp.gt.f32.partialorder %v990_v34, 0.0 }
 0x1e6   :  { %v503_v24 = vpop.f32.mrf.mxu1  ;;  %1031 = vmatmul.bf16.gmra.mxu3 %v729_v10  ;;  %v1117_v36 = vsel %vm1053_vm9, %v990_v34, %v1085_v38 }
 0x1e7   :  { %v1143_v42 = vpack.c.bf16 %v1117_v36, %v1116_v3  ;;  %v504_v56 = vadd.f32 %v503_v24, %v2109_v40 }
 0x1e9   :  { %v992_v43 = vpop.f32.mrf.mxu3  ;;  %1251 = vmatmul.bf16.gmra.mxu0 %v1143_v42  ;;  %v633_v59 = vmul.f32 0.01, %v504_v56  ;;  %vm569_vm10 = vcmp.gt.f32.partialorder %v504_v56, 0.0  ;;  %v923_v13 = vpop.f32.mrf.mxu2 }
 0x1ea   :  { %v993_v47 = vadd.f32 %v992_v43, %v904_v46  ;;  %v924_v43 = vadd.f32 %v2212_v48, %v923_v13 }
 0x1eb   :  { %v697_v6 = vsel %vm569_vm10, %v504_v56, %v633_v59 }
 0x1ec   :  { %v1086_v44 = vmul.f32 0.01, %v993_v47  ;;  %vm1054_vm12 = vcmp.gt.f32.partialorder %v993_v47, 0.0 }
 0x1ee   :  { %v505_v52 = vpop.f32.mrf.mxu1  ;;  %v1118_v31 = vsel %vm1054_vm12, %v993_v47, %v1086_v44 }
 0x1ef   :  { %v506_v54 = vadd.f32 %v505_v52, %v2109_v40 }
 0x1f1   :  { %vm571_vm11 = vcmp.gt.f32.partialorder %v506_v54, 0.0  ;;  %v635_v23 = vmul.f32 0.01, %v506_v54  ;;  %v994_v0 = vpop.f32.mrf.mxu3  ;;  %v925_v25 = vpop.f32.mrf.mxu2 }
 0x1f2   :  { %v995_v1 = vadd.f32 %v994_v0, %v906_v61  ;;  %v926_v59 = vadd.f32 %v2212_v48, %v925_v25 }
 0x1f3   :  { %v699_v16 = vsel %vm571_vm11, %v506_v54, %v635_v23 }
 0x1f4   :  { %v1087_v4 = vmul.f32 0.01, %v995_v1  ;;  %v731_v45 = vpack.c.bf16 %v699_v16, %v697_v6  ;;  %vm1055_vm13 = vcmp.gt.f32.partialorder %v995_v1, 0.0 }
 0x1f6   :  { %1036 = vmatmul.bf16.gmra.mxu3 %v731_v45  ;;  %v1119_v21 = vsel %vm1055_vm13, %v995_v1, %v1087_v4 }
 0x1f7   :  { %v1144_v40 = vpack.c.bf16 %v1119_v21, %v1118_v31 }
 0x1f9   :  { %v997_v27 = vpop.f32.mrf.mxu3  ;;  %1256 = vmatmul.bf16.gmra.mxu0 %v1144_v40  ;;  %v928_v38 = vpop.f32.mrf.mxu2 }
 0x1fa   :  { %v998_v30 = vadd.f32 %v997_v27, %v909_v28  ;;  %v929_v45 = vadd.f32 %v2212_v48, %v928_v38 }
 0x1fc   :  { %v1088_v17 = vmul.f32 0.01, %v998_v30  ;;  %vm1056_vm14 = vcmp.gt.f32.partialorder %v998_v30, 0.0 }
 0x1fe   :  { %v1120_v18 = vsel %vm1056_vm14, %v998_v30, %v1088_v17 }
 0x201   :  { %v999_v9 = vpop.f32.mrf.mxu3  ;;  %v930_v56 = vpop.f32.mrf.mxu2 }
 0x202   :  { %v1000_v53 = vadd.f32 %v999_v9, %v911_v7  ;;  %v931_v27 = vadd.f32 %v2212_v48, %v930_v56 }
 0x204   :  { %v1089_v49 = vmul.f32 0.01, %v1000_v53  ;;  %vm1057_vm15 = vcmp.gt.f32.partialorder %v1000_v53, 0.0 }
 0x206   :  { %v1121_v19 = vsel %vm1057_vm15, %v1000_v53, %v1089_v49 }
 0x207   :  { %v1145_v51 = vpack.c.bf16 %v1121_v19, %v1120_v18 }
 0x209   :  { %v1002_v14 = vpop.f32.mrf.mxu3  ;;  %1261 = vmatmul.bf16.gmra.mxu0 %v1145_v51  ;;  %v933_v6 = vpop.f32.mrf.mxu2 }
 0x20a   :  { %v1003_v22 = vadd.f32 %v1002_v14, %v914_v41  ;;  %v934_v51 = vadd.f32 %v2212_v48, %v933_v6 }
 0x20c   :  { %v1090_v12 = vmul.f32 0.01, %v1003_v22  ;;  %vm1058_vm0 = vcmp.gt.f32.partialorder %v1003_v22, 0.0 }
 0x20e   :  { %v1122_v5 = vsel %vm1058_vm0, %v1003_v22, %v1090_v12 }
 0x211   :  { %v1004_v8 = vpop.f32.mrf.mxu3  ;;  %v935_v57 = vpop.f32.mrf.mxu2 }
 0x212   :  { %v1005_v55 = vadd.f32 %v1004_v8, %v916_v20  ;;  %v936_v13 = vadd.f32 %v2212_v48, %v935_v57 }
 0x214   :  { %vm1059_vm1 = vcmp.gt.f32.partialorder %v1005_v55, 0.0  ;;  %v1091_v37 = vmul.f32 0.01, %v1005_v55 }
 0x216   :  { %v1227_v11 = vpop.f32.mrf.mxu0  ;;  %v1123_v63 = vsel %vm1059_vm1, %v1005_v55, %v1091_v37 }
 0x217   :  { %v1146_v15 = vpack.c.bf16 %v1123_v63, %v1122_v5 }
 0x219   :  { %v1007_v50 = vpop.f32.mrf.mxu3  ;;  %1266 = vmatmul.bf16.gmra.mxu0 %v1146_v15  ;;  %v938_v19 = vpop.f32.mrf.mxu2 }
 0x21a   :  { %v1008_v26 = vadd.f32 %v1007_v50, %v919_v39  ;;  %v939_v50 = vadd.f32 %v2212_v48, %v938_v19 }
 0x21c   :  { %v1092_v2 = vmul.f32 0.01, %v1008_v26  ;;  %vm1060_vm2 = vcmp.gt.f32.partialorder %v1008_v26, 0.0 }
 0x21e   :  { %v1229_v29 = vpop.f32.mrf.mxu0  ;;  %v1124_v3 = vsel %vm1060_vm2, %v1008_v26, %v1092_v2 }
 0x21f   :  { %v1675_v32 = vpack.c.bf16 %v1229_v29, %v1227_v11 }
 0x221   :  { %1676 = vst [vmem:[#allocation11] sm:$0xff] %v1675_v32   ;;  %v1009_v34 = vpop.f32.mrf.mxu3  ;;  %v940_v37 = vpop.f32.mrf.mxu2 }
 0x222   :  { %v1010_v60 = vadd.f32 %v1009_v34, %v921_v33  ;;  %v941_v33 = vadd.f32 %v2212_v48, %v940_v37 }
 0x224   :  { %vm1061_vm3 = vcmp.gt.f32.partialorder %v1010_v60, 0.0  ;;  %v1093_v10 = vmul.f32 0.01, %v1010_v60 }
 0x226   :  { %v1232_v24 = vpop.f32.mrf.mxu0  ;;  %v1125_v36 = vsel %vm1061_vm3, %v1010_v60, %v1093_v10 }
 0x227   :  { %v1147_v35 = vpack.c.bf16 %v1125_v36, %v1124_v3 }
 0x229   :  { %v1012_v42 = vpop.f32.mrf.mxu3  ;;  %1271 = vmatmul.bf16.gmra.mxu0 %v1147_v35  ;;  %v943_v29 = vpop.f32.mrf.mxu2 }
 0x22a   :  { %v1013_v46 = vadd.f32 %v1012_v42, %v924_v43  ;;  %v944_v43 = vadd.f32 %v2212_v48, %v943_v29 }
 0x22c   :  { %v1094_v61 = vmul.f32 0.01, %v1013_v46  ;;  %vm1062_vm4 = vcmp.gt.f32.partialorder %v1013_v46, 0.0 }
 0x22e   :  { %v1234_v47 = vpop.f32.mrf.mxu0  ;;  %v1126_v44 = vsel %vm1062_vm4, %v1013_v46, %v1094_v61 }
 0x22f   :  { %v1680_v52 = vpack.c.bf16 %v1234_v47, %v1232_v24 }
 0x231   :  { %1752 = vst [vmem:[#allocation11 + $0x8] sm:$0xff] %v1680_v52   ;;  %v1014_v54 = vpop.f32.mrf.mxu3  ;;  %v945_v35 = vpop.f32.mrf.mxu2 }
 0x232   :  { %v1015_v62 = vadd.f32 %v1014_v54, %v926_v59  ;;  %v946_v52 = vadd.f32 %v2212_v48, %v945_v35 }
 0x234   :  { %vm1063_vm5 = vcmp.gt.f32.partialorder %v1015_v62, 0.0  ;;  %v1095_v23 = vmul.f32 0.01, %v1015_v62 }
 0x236   :  { %v1237_v0 = vpop.f32.mrf.mxu0  ;;  %v1127_v1 = vsel %vm1063_vm5, %v1015_v62, %v1095_v23 }
 0x237   :  { %v1148_v16 = vpack.c.bf16 %v1127_v1, %v1126_v44 }
 0x239   :  { %v1017_v4 = vpop.f32.mrf.mxu3  ;;  %1276 = vmatmul.bf16.gmra.mxu0 %v1148_v16  ;;  %v948_v62 = vpop.f32.mrf.mxu2 }
 0x23a   :  { %v1018_v31 = vadd.f32 %v1017_v4, %v929_v45  ;;  %v949_v4 = vadd.f32 %v2212_v48, %v948_v62 }
 0x23c   :  { %v1096_v30 = vmul.f32 0.01, %v1018_v31  ;;  %vm1064_vm6 = vcmp.gt.f32.partialorder %v1018_v31, 0.0 }
 0x23e   :  { %v1239_v21 = vpop.f32.mrf.mxu0  ;;  %v1128_v53 = vsel %vm1064_vm6, %v1018_v31, %v1096_v30 }
 0x23f   :  { %v1685_v40 = vpack.c.bf16 %v1239_v21, %v1237_v0 }
 0x241   :  { %1753 = vst [vmem:[#allocation11 + $0x10] sm:$0xff] %v1685_v40   ;;  %v1019_v28 = vpop.f32.mrf.mxu3  ;;  %v950_v45 = vpop.f32.mrf.mxu2 }
 0x242   :  { %v1020_v7 = vadd.f32 %v1019_v28, %v931_v27  ;;  %v951_v27 = vadd.f32 %v2212_v48, %v950_v45 }
 0x244   :  { %vm1065_vm7 = vcmp.gt.f32.partialorder %v1020_v7, 0.0  ;;  %v1097_v9 = vmul.f32 0.01, %v1020_v7 }
 0x246   :  { %v1242_v17 = vpop.f32.mrf.mxu0  ;;  %v1129_v49 = vsel %vm1065_vm7, %v1020_v7, %v1097_v9 }
 0x247   :  { %v1149_v58 = vpack.c.bf16 %v1129_v49, %v1128_v53 }
 0x249   :  { %v1022_v18 = vpop.f32.mrf.mxu3  ;;  %1281 = vmatmul.bf16.gmra.mxu0 %v1149_v58 }
 0x24a   :  { %v1023_v14 = vadd.f32 %v1022_v18, %v934_v51 }
 0x24c   :  { %v1098_v8 = vmul.f32 0.01, %v1023_v14  ;;  %vm1066_vm8 = vcmp.gt.f32.partialorder %v1023_v14, 0.0 }
 0x24e   :  { %v1244_v41 = vpop.f32.mrf.mxu0  ;;  %v1130_v5 = vsel %vm1066_vm8, %v1023_v14, %v1098_v8 }
 0x24f   :  { %v1690_v22 = vpack.c.bf16 %v1244_v41, %v1242_v17 }
 0x251   :  { %1754 = vst [vmem:[#allocation11 + $0x18] sm:$0xff] %v1690_v22   ;;  %v1024_v20 = vpop.f32.mrf.mxu3 }
 0x252   :  { %v1025_v12 = vadd.f32 %v1024_v20, %v936_v13 }
 0x254   :  { %vm1067_vm9 = vcmp.gt.f32.partialorder %v1025_v12, 0.0  ;;  %v1099_v55 = vmul.f32 0.01, %v1025_v12 }
 0x256   :  { %v1247_v11 = vpop.f32.mrf.mxu0  ;;  %v1131_v63 = vsel %vm1067_vm9, %v1025_v12, %v1099_v55 }
 0x257   :  { %v1150_v15 = vpack.c.bf16 %v1131_v63, %v1130_v5 }
 0x259   :  { %v1027_v25 = vpop.f32.mrf.mxu3  ;;  %1286 = vmatmul.bf16.gmra.mxu0 %v1150_v15 }
 0x25a   :  { %v1028_v39 = vadd.f32 %v1027_v25, %v939_v50 }
 0x25c   :  { %v1100_v2 = vmul.f32 0.01, %v1028_v39  ;;  %vm1068_vm10 = vcmp.gt.f32.partialorder %v1028_v39, 0.0 }
 0x25e   :  { %v1249_v26 = vpop.f32.mrf.mxu0  ;;  %v1132_v24 = vsel %vm1068_vm10, %v1028_v39, %v1100_v2 }
 0x25f   :  { %v1695_v32 = vpack.c.bf16 %v1249_v26, %v1247_v11 }
 0x261   :  { %1755 = vst [vmem:[#allocation11 + $0x20] sm:$0xff] %v1695_v32   ;;  %v1029_v34 = vpop.f32.mrf.mxu3 }
 0x262   :  { %v1030_v60 = vadd.f32 %v1029_v34, %v941_v33 }
 0x264   :  { %vm1069_vm11 = vcmp.gt.f32.partialorder %v1030_v60, 0.0  ;;  %v1101_v38 = vmul.f32 0.01, %v1030_v60 }
 0x266   :  { %v1252_v10 = vpop.f32.mrf.mxu0  ;;  %v1133_v3 = vsel %vm1069_vm11, %v1030_v60, %v1101_v38 }
 0x267   :  { %v1151_v36 = vpack.c.bf16 %v1133_v3, %v1132_v24 }
 0x269   :  { %v1032_v42 = vpop.f32.mrf.mxu3  ;;  %1291 = vmatmul.bf16.gmra.mxu0 %v1151_v36 }
 0x26a   :  { %v1033_v56 = vadd.f32 %v1032_v42, %v944_v43 }
 0x26c   :  { %v1102_v54 = vmul.f32 0.01, %v1033_v56  ;;  %vm1070_vm12 = vcmp.gt.f32.partialorder %v1033_v56, 0.0 }
 0x26e   :  { %v1254_v46 = vpop.f32.mrf.mxu0  ;;  %v1134_v44 = vsel %vm1070_vm12, %v1033_v56, %v1102_v54 }
 0x26f   :  { %v1700_v47 = vpack.c.bf16 %v1254_v46, %v1252_v10 }
 0x271   :  { %1756 = vst [vmem:[#allocation11 + $0x28] sm:$0xff] %v1700_v47   ;;  %v1034_v59 = vpop.f32.mrf.mxu3 }
 0x272   :  { %v1035_v61 = vadd.f32 %v1034_v59, %v946_v52 }
 0x274   :  { %vm1071_vm13 = vcmp.gt.f32.partialorder %v1035_v61, 0.0  ;;  %v1103_v23 = vmul.f32 0.01, %v1035_v61 }
 0x276   :  { %v1257_v0 = vpop.f32.mrf.mxu0  ;;  %v1135_v1 = vsel %vm1071_vm13, %v1035_v61, %v1103_v23 }
 0x277   :  { %v1152_v6 = vpack.c.bf16 %v1135_v1, %v1134_v44 }
 0x279   :  { %v1037_v16 = vpop.f32.mrf.mxu3  ;;  %1296 = vmatmul.bf16.gmra.mxu0 %v1152_v6 }
 0x27a   :  { %v1038_v31 = vadd.f32 %v1037_v16, %v949_v4 }
 0x27c   :  { %v1104_v28 = vmul.f32 0.01, %v1038_v31  ;;  %vm1072_vm14 = vcmp.gt.f32.partialorder %v1038_v31, 0.0 }
 0x27e   :  { %v1259_v21 = vpop.f32.mrf.mxu0  ;;  %v1136_v17 = vsel %vm1072_vm14, %v1038_v31, %v1104_v28 }
 0x27f   :  { %v1705_v40 = vpack.c.bf16 %v1259_v21, %v1257_v0 }
 0x281   :  { %1757 = vst [vmem:[#allocation11 + $0x30] sm:$0xff] %v1705_v40   ;;  %v1039_v57 = vpop.f32.mrf.mxu3 }
 0x282   :  { %v1040_v30 = vadd.f32 %v1039_v57, %v951_v27 }
 0x284   :  { %vm1073_vm15 = vcmp.gt.f32.partialorder %v1040_v30, 0.0  ;;  %v1105_v7 = vmul.f32 0.01, %v1040_v30 }
 0x286   :  { %v1262_v9 = vpop.f32.mrf.mxu0  ;;  %v1137_v53 = vsel %vm1073_vm15, %v1040_v30, %v1105_v7 }
 0x287   :  { %v1153_v49 = vpack.c.bf16 %v1137_v53, %v1136_v17 }
 0x289   :  { %1301 = vmatmul.bf16.gmra.mxu0 %v1153_v49 }
 0x28e   :  { %v1264_v58 = vpop.f32.mrf.mxu0 }
 0x28f   :  { %v1710_v18 = vpack.c.bf16 %v1264_v58, %v1262_v9 }
 0x291   :  { %1758 = vst [vmem:[#allocation11 + $0x38] sm:$0xff] %v1710_v18  }
 0x296   :  { %v1267_v19 = vpop.f32.mrf.mxu0 }
 0x29e   :  { %v1269_v51 = vpop.f32.mrf.mxu0 }
 0x29f   :  { %v1715_v14 = vpack.c.bf16 %v1269_v51, %v1267_v19 }
 0x2a1   :  { %1759 = vst [vmem:[#allocation11 + $0x40] sm:$0xff] %v1715_v14  }
 0x2a6   :  { %v1272_v48 = vpop.f32.mrf.mxu0 }
 0x2ae   :  { %v1274_v41 = vpop.f32.mrf.mxu0 }
 0x2af   :  { %v1720_v22 = vpack.c.bf16 %v1274_v41, %v1272_v48 }
 0x2b1   :  { %1760 = vst [vmem:[#allocation11 + $0x48] sm:$0xff] %v1720_v22  }
 0x2b6   :  { %v1277_v13 = vpop.f32.mrf.mxu0 }
 0x2be   :  { %v1279_v20 = vpop.f32.mrf.mxu0 }
 0x2bf   :  { %v1725_v8 = vpack.c.bf16 %v1279_v20, %v1277_v13 }
 0x2c1   :  { %1761 = vst [vmem:[#allocation11 + $0x50] sm:$0xff] %v1725_v8  }
 0x2c6   :  { %v1282_v12 = vpop.f32.mrf.mxu0 }
 0x2ce   :  { %v1284_v55 = vpop.f32.mrf.mxu0 }
 0x2cf   :  { %v1730_v37 = vpack.c.bf16 %v1284_v55, %v1282_v12 }
 0x2d1   :  { %1762 = vst [vmem:[#allocation11 + $0x58] sm:$0xff] %v1730_v37  }
 0x2d6   :  { %v1287_v11 = vpop.f32.mrf.mxu0 }
 0x2de   :  { %v1289_v5 = vpop.f32.mrf.mxu0 }
 0x2df   :  { %v1735_v63 = vpack.c.bf16 %v1289_v5, %v1287_v11 }
 0x2e1   :  { %1763 = vst [vmem:[#allocation11 + $0x60] sm:$0xff] %v1735_v63  }
 0x2e6   :  { %v1292_v15 = vpop.f32.mrf.mxu0 }
 0x2ee   :  { %v1294_v25 = vpop.f32.mrf.mxu0 }
 0x2ef   :  { %v1740_v50 = vpack.c.bf16 %v1294_v25, %v1292_v15 }
 0x2f1   :  { %1764 = vst [vmem:[#allocation11 + $0x68] sm:$0xff] %v1740_v50  }
 0x2f6   :  { %v1297_v39 = vpop.f32.mrf.mxu0 }
 0x2fe   :  { %v1299_v26 = vpop.f32.mrf.mxu0 }
 0x2ff   :  { %v1745_v29 = vpack.c.bf16 %v1299_v26, %v1297_v39 }
 0x301   :  { %1765 = vst [vmem:[#allocation11 + $0x70] sm:$0xff] %v1745_v29  }
 0x306   :  { %v1302_v32 = vpop.f32.mrf.mxu0 }
 0x30e   :  { %v1304_v33 = vpop.f32.mrf.mxu0 }
 0x30f   :  { %v1750_v34 = vpack.c.bf16 %v1304_v33, %v1302_v32 }
 0x311   :  { %1766 = vst [vmem:[#allocation11 + $0x78] sm:$0xff] %v1750_v34  }
 0x312   :  { %1383 = dma.vmem_to_hbm [thread:$0]  %s1376_s23, 2048, %s1378_s26, [#allocation4], %s1958_s1, %s1958_s1, %s1959_s12  }
 0x313   :  { %1952 = dma.done.wait [#allocation4], 2048  }
 0x314   :  { %1953 = vsyncadd [#allocation4], 4294965248 }
 0x315   :  { %1388 = vsyncpa [#allocation3], 1 }
 0x316   :  { %1389 = vsyncpa [#allocation6], 1 }
 0x317   :  { %1390 = vsyncpa [#allocation9], 1 }
 0x318   :  { %1391 = vsyncpa [#allocation4], 1 }

</bundles_post_ra>
